<compile_context>
chip_gen: v5e
topology: v5e:2x2
jax: 0.10.0
libtpu: 0.0.40
codegen_flags: <defaults>
</compile_context>

<pallas_src>
import math

import jax
import jax.numpy as jnp
from jax import lax
from jax.experimental import pallas as pl
from jax.experimental.pallas import tpu as pltpu


def _pick_time_block(seq_len, cap=32):
    """Largest divisor of seq_len that is <= cap (so the grid tiles exactly)."""
    for t in range(min(cap, seq_len), 0, -1):
        if seq_len % t == 0:
            return t
    return 1


def _make_gru_kernel(num_layers, hidden, t_blk):
    """GRU kernel for a fixed (static) number of layers and time-block size.

    Kernel args (in order):
      x_ref                                   : (T_BLK, B, E)  time block of inputs
      [w_ih_cat, w_hh_cat, b_gi, b_hn] * L    : packed per-layer weights
            w_ih_cat : (in_l, 3H)   gate order (r, z, n) along columns
            w_hh_cat : (H,   3H)
            b_gi     : (1,   3H)    = [b_ih_r+b_hh_r, b_ih_z+b_hh_z, b_ih_n]
            b_hn     : (1,    H)    = b_hh_n  (must stay inside the r* product)
      out_ref                                 : (T_BLK, B, H)  top-layer outputs
      state_ref                               : (L, B, H)      final hidden state
      h_scratch                               : (L, B, H)      VMEM carry across blocks
      act_scratch                             : (T_BLK, B, H)  current layer's outputs
      gi_scratch                              : (T_BLK, B, 3H) block input projections
    """
    L, H = num_layers, hidden

    def kernel(x_ref, *rest):
        n_w = 4 * L
        w_refs = rest[:n_w]
        out_ref = rest[n_w]
        state_ref = rest[n_w + 1]
        h_scratch = rest[n_w + 2]
        act_scratch = rest[n_w + 3]
        gi_scratch = rest[n_w + 4]

        blk = pl.program_id(0)
        B = x_ref.shape[1]

        @pl.when(blk == 0)
        def _init():
            h_scratch[...] = jnp.zeros_like(h_scratch)

        for l in range(L):
            w_ih = w_refs[4 * l + 0][...]   # (in_l, 3H)
            w_hh = w_refs[4 * l + 1][...]   # (H, 3H)
            b_gi = w_refs[4 * l + 2][...]   # (1, 3H)
            b_hn = w_refs[4 * l + 3][...]   # (1, H)

            # --- hoisted input projection for the whole time block (one GEMM) ---
            if l == 0:
                inp2d = x_ref[...].reshape(t_blk * B, -1)
            else:
                inp2d = act_scratch[...].reshape(t_blk * B, H)
            gi = jnp.dot(inp2d, w_ih, preferred_element_type=jnp.float32) + b_gi
            gi_scratch[...] = gi.reshape(t_blk, B, 3 * H)

            is_top = (l == L - 1)

            # --- serial recurrence: only h @ W_hh_cat per step ---
            def step(t, h):
                gi_t = gi_scratch[t]                                        # (B, 3H)
                gh = jnp.dot(h, w_hh, preferred_element_type=jnp.float32)   # (B, 3H)
                r = jax.nn.sigmoid(gi_t[:, 0 * H:1 * H] + gh[:, 0 * H:1 * H])
                z = jax.nn.sigmoid(gi_t[:, 1 * H:2 * H] + gh[:, 1 * H:2 * H])
                n = jnp.tanh(gi_t[:, 2 * H:3 * H] + r * (gh[:, 2 * H:3 * H] + b_hn))
                h_new = (1.0 - z) * n + z * h
                if is_top:
                    out_ref[t] = h_new.astype(out_ref.dtype)
                else:
                    act_scratch[t] = h_new
                return h_new

            h_final = lax.fori_loop(0, t_blk, step, h_scratch[l], unroll=True)
            h_scratch[l] = h_final

        @pl.when(blk == pl.num_programs(0) - 1)
        def _finalize():
            state_ref[...] = h_scratch[...].astype(state_ref.dtype)

    return kernel


def seq2seq_encoder(tokens, params, num_hiddens, num_layers,
                    t_blk_cap=32, vmem_limit_bytes=None):
    """Forward pass equivalent to Seq2SeqEncoder.forward (eval mode, dropout=0)."""
    # ---- glue: embedding lookup + permute(1, 0, 2) ----
    emb = jnp.take(params["embedding"], tokens, axis=0)            # (B, S, E)
    X = jnp.transpose(emb, (1, 0, 2)).astype(jnp.float32)          # (S, B, E)
    S, B, E = X.shape
    H, L = num_hiddens, num_layers
    t_blk = _pick_time_block(S, t_blk_cap)

    # ---- pack weights: fuse gates along columns, pre-sum r/z biases ----
    weight_args = []
    in_specs = [pl.BlockSpec((t_blk, B, E), lambda b: (b, 0, 0))]
    for l in range(L):
        w_ih = params[f"w_ih_{l}"]   # (3, in_l, H)  gate order (r, z, n)
        w_hh = params[f"w_hh_{l}"]   # (3, H, H)
        b_ih = params[f"b_ih_{l}"]   # (3, 1, H)
        b_hh = params[f"b_hh_{l}"]   # (3, 1, H)
        w_ih_cat = jnp.concatenate([w_ih[0], w_ih[1], w_ih[2]], axis=1)    # (in_l, 3H)
        w_hh_cat = jnp.concatenate([w_hh[0], w_hh[1], w_hh[2]], axis=1)    # (H, 3H)
        b_gi = jnp.concatenate([b_ih[0] + b_hh[0],
                                b_ih[1] + b_hh[1],
                                b_ih[2]], axis=1)                          # (1, 3H)
        b_hn = b_hh[2]                                                     # (1, H)
        for w in (w_ih_cat, w_hh_cat, b_gi, b_hn):
            weight_args.append(w)
            in_specs.append(pl.BlockSpec(w.shape, lambda b: (0, 0)))

    kernel = _make_gru_kernel(L, H, t_blk)

    compiler_kwargs = dict(dimension_semantics=("arbitrary",))  # time is sequential
    if vmem_limit_bytes is not None:
        compiler_kwargs["vmem_limit_bytes"] = vmem_limit_bytes

    output, state = pl.pallas_call(
        kernel,
        out_shape=(
            jax.ShapeDtypeStruct((S, B, H), jnp.float32),
            jax.ShapeDtypeStruct((L, B, H), jnp.float32),
        ),
        grid_spec=pltpu.PrefetchScalarGridSpec(
            num_scalar_prefetch=0,
            grid=(S // t_blk,),
            in_specs=in_specs,
            out_specs=[
                pl.BlockSpec((t_blk, B, H), lambda b: (b, 0, 0)),
                pl.BlockSpec((L, B, H), lambda b: (0, 0, 0)),
            ],
            scratch_shapes=[
                pltpu.VMEM((L, B, H), jnp.float32),        # hidden-state carry
                pltpu.VMEM((t_blk, B, H), jnp.float32),    # per-layer block outputs
                pltpu.VMEM((t_blk, B, 3 * H), jnp.float32),  # block input projections
            ],
        ),
        compiler_params=pltpu.CompilerParams(**compiler_kwargs),
    )(X, *weight_args)
    return output, state


def gru_reference(tokens, params, num_hiddens, num_layers):
    """Pure-JAX reference identical to PyTorch nn.Embedding + nn.GRU semantics."""
    emb = jnp.take(params["embedding"], tokens, axis=0)
    X = jnp.transpose(emb, (1, 0, 2)).astype(jnp.float32)
    S, B, _ = X.shape
    H, L = num_hiddens, num_layers
    h = [jnp.zeros((B, H), jnp.float32) for _ in range(L)]
    outs = []
    for t in range(S):
        x = X[t]
        for l in range(L):
            wih = params[f"w_ih_{l}"]
            whh = params[f"w_hh_{l}"]
            bih = params[f"b_ih_{l}"]
            bhh = params[f"b_hh_{l}"]
            gi = [x @ wih[g] + bih[g, 0] for g in range(3)]
            gh = [h[l] @ whh[g] + bhh[g, 0] for g in range(3)]
            r = jax.nn.sigmoid(gi[0] + gh[0])
            z = jax.nn.sigmoid(gi[1] + gh[1])
            n = jnp.tanh(gi[2] + r * gh[2])
            h[l] = (1.0 - z) * n + z * h[l]
            x = h[l]
        outs.append(x)
    return jnp.stack(outs), jnp.stack(h)


def init_params(key, vocab_size, embed_size, num_hiddens, num_layers):
    """Deterministic parameter init (PyTorch-style shapes, gate order r, z, n)."""
    H = num_hiddens
    bound = 1.0 / math.sqrt(H)
    keys = jax.random.split(key, 1 + 4 * num_layers)
    params = {
        "embedding": jax.random.normal(
            keys[0], (vocab_size, embed_size), dtype=jnp.float32
        )
    }
    idx = 1
    for l in range(num_layers):
        in_sz = embed_size if l == 0 else H
        params[f"w_ih_{l}"] = jax.random.uniform(
            keys[idx], (3, in_sz, H), jnp.float32, -bound, bound); idx += 1
        params[f"w_hh_{l}"] = jax.random.uniform(
            keys[idx], (3, H, H), jnp.float32, -bound, bound); idx += 1
        params[f"b_ih_{l}"] = jax.random.uniform(
            keys[idx], (3, 1, H), jnp.float32, -bound, bound); idx += 1
        params[f"b_hh_{l}"] = jax.random.uniform(
            keys[idx], (3, 1, H), jnp.float32, -bound, bound); idx += 1
    return params


if __name__ == "__main__":
    vocab_size, embed_size, num_hiddens, num_layers = 30, 16, 32, 2
    batch, seq_len = 2, 8

    root = jax.random.PRNGKey(0)
    k_params, k_tokens = jax.random.split(root)
    params = init_params(k_params, vocab_size, embed_size, num_hiddens, num_layers)
    tokens = jax.random.randint(
        k_tokens, (batch, seq_len), 0, vocab_size, dtype=jnp.int32
    )  # X: (batch, seq) token ids, like the PyTorch module input

    output, state = seq2seq_encoder(tokens, params, num_hiddens, num_layers)
    jax.block_until_ready((output, state))

    assert output.shape == (seq_len, batch, num_hiddens)
    assert state.shape == (num_layers, batch, num_hiddens)

    ref_out, ref_state = gru_reference(tokens, params, num_hiddens, num_layers)
    assert jnp.allclose(output, ref_out, atol=2e-5, rtol=2e-5), "output mismatch"
    assert jnp.allclose(state, ref_state, atol=2e-5, rtol=2e-5), "state mismatch"

    print("KERNEL_OK")
</pallas_src>

<mosaic_0001>
module attributes {stable_mosaic.version = 11 : i64} {
  func.func @kernel(%arg0: i32, %arg1: memref<8x2x16xf32, #tpu.memory_space<vmem>>, %arg2: memref<16x96xf32, #tpu.memory_space<vmem>>, %arg3: memref<32x96xf32, #tpu.memory_space<vmem>>, %arg4: memref<1x96xf32, #tpu.memory_space<vmem>>, %arg5: memref<1x32xf32, #tpu.memory_space<vmem>>, %arg6: memref<32x96xf32, #tpu.memory_space<vmem>>, %arg7: memref<32x96xf32, #tpu.memory_space<vmem>>, %arg8: memref<1x96xf32, #tpu.memory_space<vmem>>, %arg9: memref<1x32xf32, #tpu.memory_space<vmem>>, %arg10: memref<8x2x32xf32, #tpu.memory_space<vmem>>, %arg11: memref<2x2x32xf32, #tpu.memory_space<vmem>>, %arg12: memref<2x2x32xf32, #tpu.memory_space<vmem>>, %arg13: memref<8x2x32xf32, #tpu.memory_space<vmem>>, %arg14: memref<8x2x96xf32, #tpu.memory_space<vmem>>) attributes {dimension_semantics = [#tpu.dimension_semantics<arbitrary>], iteration_bounds = array<i64: 1>, scalar_prefetch = 0 : i64, scratch_operands = 3 : i64, tpu.core_type = #tpu.core_type<tc>, window_params = [{transform_indices = @transform_0, window_bounds = array<i64: 8, 2, 16>}, {pipeline_mode = #tpu.pipeline_mode<synchronous>, transform_indices = @transform_1, window_bounds = array<i64: 16, 96>}, {pipeline_mode = #tpu.pipeline_mode<synchronous>, transform_indices = @transform_2, window_bounds = array<i64: 32, 96>}, {pipeline_mode = #tpu.pipeline_mode<synchronous>, transform_indices = @transform_3, window_bounds = array<i64: 1, 96>}, {pipeline_mode = #tpu.pipeline_mode<synchronous>, transform_indices = @transform_4, window_bounds = array<i64: 1, 32>}, {pipeline_mode = #tpu.pipeline_mode<synchronous>, transform_indices = @transform_5, window_bounds = array<i64: 32, 96>}, {pipeline_mode = #tpu.pipeline_mode<synchronous>, transform_indices = @transform_6, window_bounds = array<i64: 32, 96>}, {pipeline_mode = #tpu.pipeline_mode<synchronous>, transform_indices = @transform_7, window_bounds = array<i64: 1, 96>}, {pipeline_mode = #tpu.pipeline_mode<synchronous>, transform_indices = @transform_8, window_bounds = array<i64: 1, 32>}, {transform_indices = @transform_9, window_bounds = array<i64: 8, 2, 32>}, {pipeline_mode = #tpu.pipeline_mode<synchronous>, transform_indices = @transform_10, window_bounds = array<i64: 2, 2, 32>}]} {
    %c0_i32 = arith.constant 0 : i32
    %0 = arith.cmpi eq, %arg0, %c0_i32 : i32
    %1 = arith.extui %0 : i1 to i32
    %c0_i32_0 = arith.constant 0 : i32
    %2 = arith.cmpi ne, %1, %c0_i32_0 : i32
    scf.if %2 {
      %cst_180 = arith.constant 0.000000e+00 : f32
      %614 = vector.broadcast %cst_180 : f32 to vector<2x2x32xf32>
      %c0_181 = arith.constant 0 : index
      %c0_182 = arith.constant 0 : index
      %c0_183 = arith.constant 0 : index
      %615 = vector.load %arg12[%c0_181, %c0_182, %c0_183] : memref<2x2x32xf32, #tpu.memory_space<vmem>>, vector<2x2x32xf32>
      tpu.vector_store %arg12[%c0_181, %c0_182, %c0_183], %614 {strides = array<i32>} : memref<2x2x32xf32, #tpu.memory_space<vmem>>, vector<2x2x32xf32>,
    } else {
    }
    %c0 = arith.constant 0 : index
    %c0_1 = arith.constant 0 : index
    %3 = vector.load %arg2[%c0, %c0_1] : memref<16x96xf32, #tpu.memory_space<vmem>>, vector<16x96xf32>
    %c0_2 = arith.constant 0 : index
    %c0_3 = arith.constant 0 : index
    %4 = vector.load %arg3[%c0_2, %c0_3] : memref<32x96xf32, #tpu.memory_space<vmem>>, vector<32x96xf32>
    %c0_4 = arith.constant 0 : index
    %c0_5 = arith.constant 0 : index
    %5 = vector.load %arg4[%c0_4, %c0_5] : memref<1x96xf32, #tpu.memory_space<vmem>>, vector<1x96xf32>
    %c0_6 = arith.constant 0 : index
    %c0_7 = arith.constant 0 : index
    %6 = vector.load %arg5[%c0_6, %c0_7] : memref<1x32xf32, #tpu.memory_space<vmem>>, vector<1x32xf32>
    %c0_8 = arith.constant 0 : index
    %c0_9 = arith.constant 0 : index
    %c0_10 = arith.constant 0 : index
    %7 = vector.load %arg1[%c0_8, %c0_9, %c0_10] : memref<8x2x16xf32, #tpu.memory_space<vmem>>, vector<8x2x16xf32>
    %8 = vector.shape_cast %7 : vector<8x2x16xf32> to vector<16x16xf32>
    %cst = arith.constant dense<0.000000e+00> : vector<16x96xf32>
    %9 = tpu.matmul %8, %3, %cst {dimension_numbers = #tpu.dot_dimension_numbers<[1], [0], [0], [1], [0, 0, 1, 1], [], []>} : vector<16x16xf32>, vector<16x96xf32>, vector<16x96xf32> -> vector<16x96xf32>
    %10 = vector.broadcast %5 : vector<1x96xf32> to vector<16x96xf32>
    %11 = arith.addf %9, %10 : vector<16x96xf32>
    %12 = vector.shape_cast %11 : vector<16x96xf32> to vector<8x2x96xf32>
    %c0_11 = arith.constant 0 : index
    %c0_12 = arith.constant 0 : index
    %c0_13 = arith.constant 0 : index
    %13 = vector.load %arg14[%c0_11, %c0_12, %c0_13] : memref<8x2x96xf32, #tpu.memory_space<vmem>>, vector<8x2x96xf32>
    tpu.vector_store %arg14[%c0_11, %c0_12, %c0_13], %12 {strides = array<i32>} : memref<8x2x96xf32, #tpu.memory_space<vmem>>, vector<8x2x96xf32>,
    %c0_14 = arith.constant 0 : index
    %c0_15 = arith.constant 0 : index
    %c0_16 = arith.constant 0 : index
    %14 = vector.load %arg12[%c0_14, %c0_15, %c0_16] : memref<2x2x32xf32, #tpu.memory_space<vmem>>, vector<1x2x32xf32>
    %15 = vector.shape_cast %14 : vector<1x2x32xf32> to vector<2x32xf32>
    %c0_i32_17 = arith.constant 0 : i32
    %16 = arith.index_cast %c0_i32_17 : i32 to index
    %c0_18 = arith.constant 0 : index
    %c0_19 = arith.constant 0 : index
    %17 = vector.load %arg14[%16, %c0_18, %c0_19] : memref<8x2x96xf32, #tpu.memory_space<vmem>>, vector<1x2x96xf32>
    %18 = vector.shape_cast %17 : vector<1x2x96xf32> to vector<2x96xf32>
    %cst_20 = arith.constant dense<0.000000e+00> : vector<2x96xf32>
    %19 = tpu.matmul %15, %4, %cst_20 {dimension_numbers = #tpu.dot_dimension_numbers<[1], [0], [0], [1], [0, 0, 1, 1], [], []>} : vector<2x32xf32>, vector<32x96xf32>, vector<2x96xf32> -> vector<2x96xf32>
    %20 = vector.extract_strided_slice %18 {offsets = [0, 0], sizes = [2, 32], strides = [1, 1]} : vector<2x96xf32> to vector<2x32xf32>
    %21 = vector.extract_strided_slice %19 {offsets = [0, 0], sizes = [2, 32], strides = [1, 1]} : vector<2x96xf32> to vector<2x32xf32>
    %22 = arith.addf %20, %21 : vector<2x32xf32>
    %23 = arith.negf %22 : vector<2x32xf32>
    %24 = math.exp %23 : vector<2x32xf32>
    %cst_21 = arith.constant 1.000000e+00 : f32
    %25 = vector.broadcast %cst_21 : f32 to vector<2x32xf32>
    %26 = arith.addf %25, %24 : vector<2x32xf32>
    %27 = arith.divf %25, %26 : vector<2x32xf32>
    %28 = vector.extract_strided_slice %18 {offsets = [0, 32], sizes = [2, 32], strides = [1, 1]} : vector<2x96xf32> to vector<2x32xf32>
    %29 = vector.extract_strided_slice %19 {offsets = [0, 32], sizes = [2, 32], strides = [1, 1]} : vector<2x96xf32> to vector<2x32xf32>
    %30 = arith.addf %28, %29 : vector<2x32xf32>
    %31 = arith.negf %30 : vector<2x32xf32>
    %32 = math.exp %31 : vector<2x32xf32>
    %cst_22 = arith.constant 1.000000e+00 : f32
    %33 = vector.broadcast %cst_22 : f32 to vector<2x32xf32>
    %34 = arith.addf %33, %32 : vector<2x32xf32>
    %35 = arith.divf %33, %34 : vector<2x32xf32>
    %36 = vector.extract_strided_slice %18 {offsets = [0, 64], sizes = [2, 32], strides = [1, 1]} : vector<2x96xf32> to vector<2x32xf32>
    %37 = vector.extract_strided_slice %19 {offsets = [0, 64], sizes = [2, 32], strides = [1, 1]} : vector<2x96xf32> to vector<2x32xf32>
    %38 = vector.broadcast %6 : vector<1x32xf32> to vector<2x32xf32>
    %39 = arith.addf %37, %38 : vector<2x32xf32>
    %40 = arith.mulf %27, %39 : vector<2x32xf32>
    %41 = arith.addf %36, %40 : vector<2x32xf32>
    %42 = math.tanh %41 : vector<2x32xf32>
    %cst_23 = arith.constant 1.000000e+00 : f32
    %43 = vector.broadcast %cst_23 : f32 to vector<2x32xf32>
    %44 = arith.subf %43, %35 : vector<2x32xf32>
    %45 = arith.mulf %44, %42 : vector<2x32xf32>
    %46 = arith.mulf %35, %15 : vector<2x32xf32>
    %47 = arith.addf %45, %46 : vector<2x32xf32>
    %48 = arith.index_cast %c0_i32_17 : i32 to index
    %c0_24 = arith.constant 0 : index
    %c0_25 = arith.constant 0 : index
    %49 = vector.load %arg13[%48, %c0_24, %c0_25] : memref<8x2x32xf32, #tpu.memory_space<vmem>>, vector<1x2x32xf32>
    %50 = vector.shape_cast %49 : vector<1x2x32xf32> to vector<2x32xf32>
    %51 = vector.shape_cast %47 : vector<2x32xf32> to vector<1x2x32xf32>
    tpu.vector_store %arg13[%48, %c0_24, %c0_25], %51 {strides = array<i32>} : memref<8x2x32xf32, #tpu.memory_space<vmem>>, vector<1x2x32xf32>,
    %c1_i32 = arith.constant 1 : i32
    %52 = arith.index_cast %c1_i32 : i32 to index
    %c0_26 = arith.constant 0 : index
    %c0_27 = arith.constant 0 : index
    %53 = vector.load %arg14[%52, %c0_26, %c0_27] : memref<8x2x96xf32, #tpu.memory_space<vmem>>, vector<1x2x96xf32>
    %54 = vector.shape_cast %53 : vector<1x2x96xf32> to vector<2x96xf32>
    %cst_28 = arith.constant dense<0.000000e+00> : vector<2x96xf32>
    %55 = tpu.matmul %47, %4, %cst_28 {dimension_numbers = #tpu.dot_dimension_numbers<[1], [0], [0], [1], [0, 0, 1, 1], [], []>} : vector<2x32xf32>, vector<32x96xf32>, vector<2x96xf32> -> vector<2x96xf32>
    %56 = vector.extract_strided_slice %54 {offsets = [0, 0], sizes = [2, 32], strides = [1, 1]} : vector<2x96xf32> to vector<2x32xf32>
    %57 = vector.extract_strided_slice %55 {offsets = [0, 0], sizes = [2, 32], strides = [1, 1]} : vector<2x96xf32> to vector<2x32xf32>
    %58 = arith.addf %56, %57 : vector<2x32xf32>
    %59 = arith.negf %58 : vector<2x32xf32>
    %60 = math.exp %59 : vector<2x32xf32>
    %cst_29 = arith.constant 1.000000e+00 : f32
    %61 = vector.broadcast %cst_29 : f32 to vector<2x32xf32>
    %62 = arith.addf %61, %60 : vector<2x32xf32>
    %63 = arith.divf %61, %62 : vector<2x32xf32>
    %64 = vector.extract_strided_slice %54 {offsets = [0, 32], sizes = [2, 32], strides = [1, 1]} : vector<2x96xf32> to vector<2x32xf32>
    %65 = vector.extract_strided_slice %55 {offsets = [0, 32], sizes = [2, 32], strides = [1, 1]} : vector<2x96xf32> to vector<2x32xf32>
    %66 = arith.addf %64, %65 : vector<2x32xf32>
    %67 = arith.negf %66 : vector<2x32xf32>
    %68 = math.exp %67 : vector<2x32xf32>
    %cst_30 = arith.constant 1.000000e+00 : f32
    %69 = vector.broadcast %cst_30 : f32 to vector<2x32xf32>
    %70 = arith.addf %69, %68 : vector<2x32xf32>
    %71 = arith.divf %69, %70 : vector<2x32xf32>
    %72 = vector.extract_strided_slice %54 {offsets = [0, 64], sizes = [2, 32], strides = [1, 1]} : vector<2x96xf32> to vector<2x32xf32>
    %73 = vector.extract_strided_slice %55 {offsets = [0, 64], sizes = [2, 32], strides = [1, 1]} : vector<2x96xf32> to vector<2x32xf32>
    %74 = vector.broadcast %6 : vector<1x32xf32> to vector<2x32xf32>
    %75 = arith.addf %73, %74 : vector<2x32xf32>
    %76 = arith.mulf %63, %75 : vector<2x32xf32>
    %77 = arith.addf %72, %76 : vector<2x32xf32>
    %78 = math.tanh %77 : vector<2x32xf32>
    %cst_31 = arith.constant 1.000000e+00 : f32
    %79 = vector.broadcast %cst_31 : f32 to vector<2x32xf32>
    %80 = arith.subf %79, %71 : vector<2x32xf32>
    %81 = arith.mulf %80, %78 : vector<2x32xf32>
    %82 = arith.mulf %71, %47 : vector<2x32xf32>
    %83 = arith.addf %81, %82 : vector<2x32xf32>
    %84 = arith.index_cast %c1_i32 : i32 to index
    %c0_32 = arith.constant 0 : index
    %c0_33 = arith.constant 0 : index
    %85 = vector.load %arg13[%84, %c0_32, %c0_33] : memref<8x2x32xf32, #tpu.memory_space<vmem>>, vector<1x2x32xf32>
    %86 = vector.shape_cast %85 : vector<1x2x32xf32> to vector<2x32xf32>
    %87 = vector.shape_cast %83 : vector<2x32xf32> to vector<1x2x32xf32>
    tpu.vector_store %arg13[%84, %c0_32, %c0_33], %87 {strides = array<i32>} : memref<8x2x32xf32, #tpu.memory_space<vmem>>, vector<1x2x32xf32>,
    %c2_i32 = arith.constant 2 : i32
    %88 = arith.index_cast %c2_i32 : i32 to index
    %c0_34 = arith.constant 0 : index
    %c0_35 = arith.constant 0 : index
    %89 = vector.load %arg14[%88, %c0_34, %c0_35] : memref<8x2x96xf32, #tpu.memory_space<vmem>>, vector<1x2x96xf32>
    %90 = vector.shape_cast %89 : vector<1x2x96xf32> to vector<2x96xf32>
    %cst_36 = arith.constant dense<0.000000e+00> : vector<2x96xf32>
    %91 = tpu.matmul %83, %4, %cst_36 {dimension_numbers = #tpu.dot_dimension_numbers<[1], [0], [0], [1], [0, 0, 1, 1], [], []>} : vector<2x32xf32>, vector<32x96xf32>, vector<2x96xf32> -> vector<2x96xf32>
    %92 = vector.extract_strided_slice %90 {offsets = [0, 0], sizes = [2, 32], strides = [1, 1]} : vector<2x96xf32> to vector<2x32xf32>
    %93 = vector.extract_strided_slice %91 {offsets = [0, 0], sizes = [2, 32], strides = [1, 1]} : vector<2x96xf32> to vector<2x32xf32>
    %94 = arith.addf %92, %93 : vector<2x32xf32>
    %95 = arith.negf %94 : vector<2x32xf32>
    %96 = math.exp %95 : vector<2x32xf32>
    %cst_37 = arith.constant 1.000000e+00 : f32
    %97 = vector.broadcast %cst_37 : f32 to vector<2x32xf32>
    %98 = arith.addf %97, %96 : vector<2x32xf32>
    %99 = arith.divf %97, %98 : vector<2x32xf32>
    %100 = vector.extract_strided_slice %90 {offsets = [0, 32], sizes = [2, 32], strides = [1, 1]} : vector<2x96xf32> to vector<2x32xf32>
    %101 = vector.extract_strided_slice %91 {offsets = [0, 32], sizes = [2, 32], strides = [1, 1]} : vector<2x96xf32> to vector<2x32xf32>
    %102 = arith.addf %100, %101 : vector<2x32xf32>
    %103 = arith.negf %102 : vector<2x32xf32>
    %104 = math.exp %103 : vector<2x32xf32>
    %cst_38 = arith.constant 1.000000e+00 : f32
    %105 = vector.broadcast %cst_38 : f32 to vector<2x32xf32>
    %106 = arith.addf %105, %104 : vector<2x32xf32>
    %107 = arith.divf %105, %106 : vector<2x32xf32>
    %108 = vector.extract_strided_slice %90 {offsets = [0, 64], sizes = [2, 32], strides = [1, 1]} : vector<2x96xf32> to vector<2x32xf32>
    %109 = vector.extract_strided_slice %91 {offsets = [0, 64], sizes = [2, 32], strides = [1, 1]} : vector<2x96xf32> to vector<2x32xf32>
    %110 = vector.broadcast %6 : vector<1x32xf32> to vector<2x32xf32>
    %111 = arith.addf %109, %110 : vector<2x32xf32>
    %112 = arith.mulf %99, %111 : vector<2x32xf32>
    %113 = arith.addf %108, %112 : vector<2x32xf32>
    %114 = math.tanh %113 : vector<2x32xf32>
    %cst_39 = arith.constant 1.000000e+00 : f32
    %115 = vector.broadcast %cst_39 : f32 to vector<2x32xf32>
    %116 = arith.subf %115, %107 : vector<2x32xf32>
    %117 = arith.mulf %116, %114 : vector<2x32xf32>
    %118 = arith.mulf %107, %83 : vector<2x32xf32>
    %119 = arith.addf %117, %118 : vector<2x32xf32>
    %120 = arith.index_cast %c2_i32 : i32 to index
    %c0_40 = arith.constant 0 : index
    %c0_41 = arith.constant 0 : index
    %121 = vector.load %arg13[%120, %c0_40, %c0_41] : memref<8x2x32xf32, #tpu.memory_space<vmem>>, vector<1x2x32xf32>
    %122 = vector.shape_cast %121 : vector<1x2x32xf32> to vector<2x32xf32>
    %123 = vector.shape_cast %119 : vector<2x32xf32> to vector<1x2x32xf32>
    tpu.vector_store %arg13[%120, %c0_40, %c0_41], %123 {strides = array<i32>} : memref<8x2x32xf32, #tpu.memory_space<vmem>>, vector<1x2x32xf32>,
    %c3_i32 = arith.constant 3 : i32
    %124 = arith.index_cast %c3_i32 : i32 to index
    %c0_42 = arith.constant 0 : index
    %c0_43 = arith.constant 0 : index
    %125 = vector.load %arg14[%124, %c0_42, %c0_43] : memref<8x2x96xf32, #tpu.memory_space<vmem>>, vector<1x2x96xf32>
    %126 = vector.shape_cast %125 : vector<1x2x96xf32> to vector<2x96xf32>
    %cst_44 = arith.constant dense<0.000000e+00> : vector<2x96xf32>
    %127 = tpu.matmul %119, %4, %cst_44 {dimension_numbers = #tpu.dot_dimension_numbers<[1], [0], [0], [1], [0, 0, 1, 1], [], []>} : vector<2x32xf32>, vector<32x96xf32>, vector<2x96xf32> -> vector<2x96xf32>
    %128 = vector.extract_strided_slice %126 {offsets = [0, 0], sizes = [2, 32], strides = [1, 1]} : vector<2x96xf32> to vector<2x32xf32>
    %129 = vector.extract_strided_slice %127 {offsets = [0, 0], sizes = [2, 32], strides = [1, 1]} : vector<2x96xf32> to vector<2x32xf32>
    %130 = arith.addf %128, %129 : vector<2x32xf32>
    %131 = arith.negf %130 : vector<2x32xf32>
    %132 = math.exp %131 : vector<2x32xf32>
    %cst_45 = arith.constant 1.000000e+00 : f32
    %133 = vector.broadcast %cst_45 : f32 to vector<2x32xf32>
    %134 = arith.addf %133, %132 : vector<2x32xf32>
    %135 = arith.divf %133, %134 : vector<2x32xf32>
    %136 = vector.extract_strided_slice %126 {offsets = [0, 32], sizes = [2, 32], strides = [1, 1]} : vector<2x96xf32> to vector<2x32xf32>
    %137 = vector.extract_strided_slice %127 {offsets = [0, 32], sizes = [2, 32], strides = [1, 1]} : vector<2x96xf32> to vector<2x32xf32>
    %138 = arith.addf %136, %137 : vector<2x32xf32>
    %139 = arith.negf %138 : vector<2x32xf32>
    %140 = math.exp %139 : vector<2x32xf32>
    %cst_46 = arith.constant 1.000000e+00 : f32
    %141 = vector.broadcast %cst_46 : f32 to vector<2x32xf32>
    %142 = arith.addf %141, %140 : vector<2x32xf32>
    %143 = arith.divf %141, %142 : vector<2x32xf32>
    %144 = vector.extract_strided_slice %126 {offsets = [0, 64], sizes = [2, 32], strides = [1, 1]} : vector<2x96xf32> to vector<2x32xf32>
    %145 = vector.extract_strided_slice %127 {offsets = [0, 64], sizes = [2, 32], strides = [1, 1]} : vector<2x96xf32> to vector<2x32xf32>
    %146 = vector.broadcast %6 : vector<1x32xf32> to vector<2x32xf32>
    %147 = arith.addf %145, %146 : vector<2x32xf32>
    %148 = arith.mulf %135, %147 : vector<2x32xf32>
    %149 = arith.addf %144, %148 : vector<2x32xf32>
    %150 = math.tanh %149 : vector<2x32xf32>
    %cst_47 = arith.constant 1.000000e+00 : f32
    %151 = vector.broadcast %cst_47 : f32 to vector<2x32xf32>
    %152 = arith.subf %151, %143 : vector<2x32xf32>
    %153 = arith.mulf %152, %150 : vector<2x32xf32>
    %154 = arith.mulf %143, %119 : vector<2x32xf32>
    %155 = arith.addf %153, %154 : vector<2x32xf32>
    %156 = arith.index_cast %c3_i32 : i32 to index
    %c0_48 = arith.constant 0 : index
    %c0_49 = arith.constant 0 : index
    %157 = vector.load %arg13[%156, %c0_48, %c0_49] : memref<8x2x32xf32, #tpu.memory_space<vmem>>, vector<1x2x32xf32>
    %158 = vector.shape_cast %157 : vector<1x2x32xf32> to vector<2x32xf32>
    %159 = vector.shape_cast %155 : vector<2x32xf32> to vector<1x2x32xf32>
    tpu.vector_store %arg13[%156, %c0_48, %c0_49], %159 {strides = array<i32>} : memref<8x2x32xf32, #tpu.memory_space<vmem>>, vector<1x2x32xf32>,
    %c4_i32 = arith.constant 4 : i32
    %160 = arith.index_cast %c4_i32 : i32 to index
    %c0_50 = arith.constant 0 : index
    %c0_51 = arith.constant 0 : index
    %161 = vector.load %arg14[%160, %c0_50, %c0_51] : memref<8x2x96xf32, #tpu.memory_space<vmem>>, vector<1x2x96xf32>
    %162 = vector.shape_cast %161 : vector<1x2x96xf32> to vector<2x96xf32>
    %cst_52 = arith.constant dense<0.000000e+00> : vector<2x96xf32>
    %163 = tpu.matmul %155, %4, %cst_52 {dimension_numbers = #tpu.dot_dimension_numbers<[1], [0], [0], [1], [0, 0, 1, 1], [], []>} : vector<2x32xf32>, vector<32x96xf32>, vector<2x96xf32> -> vector<2x96xf32>
    %164 = vector.extract_strided_slice %162 {offsets = [0, 0], sizes = [2, 32], strides = [1, 1]} : vector<2x96xf32> to vector<2x32xf32>
    %165 = vector.extract_strided_slice %163 {offsets = [0, 0], sizes = [2, 32], strides = [1, 1]} : vector<2x96xf32> to vector<2x32xf32>
    %166 = arith.addf %164, %165 : vector<2x32xf32>
    %167 = arith.negf %166 : vector<2x32xf32>
    %168 = math.exp %167 : vector<2x32xf32>
    %cst_53 = arith.constant 1.000000e+00 : f32
    %169 = vector.broadcast %cst_53 : f32 to vector<2x32xf32>
    %170 = arith.addf %169, %168 : vector<2x32xf32>
    %171 = arith.divf %169, %170 : vector<2x32xf32>
    %172 = vector.extract_strided_slice %162 {offsets = [0, 32], sizes = [2, 32], strides = [1, 1]} : vector<2x96xf32> to vector<2x32xf32>
    %173 = vector.extract_strided_slice %163 {offsets = [0, 32], sizes = [2, 32], strides = [1, 1]} : vector<2x96xf32> to vector<2x32xf32>
    %174 = arith.addf %172, %173 : vector<2x32xf32>
    %175 = arith.negf %174 : vector<2x32xf32>
    %176 = math.exp %175 : vector<2x32xf32>
    %cst_54 = arith.constant 1.000000e+00 : f32
    %177 = vector.broadcast %cst_54 : f32 to vector<2x32xf32>
    %178 = arith.addf %177, %176 : vector<2x32xf32>
    %179 = arith.divf %177, %178 : vector<2x32xf32>
    %180 = vector.extract_strided_slice %162 {offsets = [0, 64], sizes = [2, 32], strides = [1, 1]} : vector<2x96xf32> to vector<2x32xf32>
    %181 = vector.extract_strided_slice %163 {offsets = [0, 64], sizes = [2, 32], strides = [1, 1]} : vector<2x96xf32> to vector<2x32xf32>
    %182 = vector.broadcast %6 : vector<1x32xf32> to vector<2x32xf32>
    %183 = arith.addf %181, %182 : vector<2x32xf32>
    %184 = arith.mulf %171, %183 : vector<2x32xf32>
    %185 = arith.addf %180, %184 : vector<2x32xf32>
    %186 = math.tanh %185 : vector<2x32xf32>
    %cst_55 = arith.constant 1.000000e+00 : f32
    %187 = vector.broadcast %cst_55 : f32 to vector<2x32xf32>
    %188 = arith.subf %187, %179 : vector<2x32xf32>
    %189 = arith.mulf %188, %186 : vector<2x32xf32>
    %190 = arith.mulf %179, %155 : vector<2x32xf32>
    %191 = arith.addf %189, %190 : vector<2x32xf32>
    %192 = arith.index_cast %c4_i32 : i32 to index
    %c0_56 = arith.constant 0 : index
    %c0_57 = arith.constant 0 : index
    %193 = vector.load %arg13[%192, %c0_56, %c0_57] : memref<8x2x32xf32, #tpu.memory_space<vmem>>, vector<1x2x32xf32>
    %194 = vector.shape_cast %193 : vector<1x2x32xf32> to vector<2x32xf32>
    %195 = vector.shape_cast %191 : vector<2x32xf32> to vector<1x2x32xf32>
    tpu.vector_store %arg13[%192, %c0_56, %c0_57], %195 {strides = array<i32>} : memref<8x2x32xf32, #tpu.memory_space<vmem>>, vector<1x2x32xf32>,
    %c5_i32 = arith.constant 5 : i32
    %196 = arith.index_cast %c5_i32 : i32 to index
    %c0_58 = arith.constant 0 : index
    %c0_59 = arith.constant 0 : index
    %197 = vector.load %arg14[%196, %c0_58, %c0_59] : memref<8x2x96xf32, #tpu.memory_space<vmem>>, vector<1x2x96xf32>
    %198 = vector.shape_cast %197 : vector<1x2x96xf32> to vector<2x96xf32>
    %cst_60 = arith.constant dense<0.000000e+00> : vector<2x96xf32>
    %199 = tpu.matmul %191, %4, %cst_60 {dimension_numbers = #tpu.dot_dimension_numbers<[1], [0], [0], [1], [0, 0, 1, 1], [], []>} : vector<2x32xf32>, vector<32x96xf32>, vector<2x96xf32> -> vector<2x96xf32>
    %200 = vector.extract_strided_slice %198 {offsets = [0, 0], sizes = [2, 32], strides = [1, 1]} : vector<2x96xf32> to vector<2x32xf32>
    %201 = vector.extract_strided_slice %199 {offsets = [0, 0], sizes = [2, 32], strides = [1, 1]} : vector<2x96xf32> to vector<2x32xf32>
    %202 = arith.addf %200, %201 : vector<2x32xf32>
    %203 = arith.negf %202 : vector<2x32xf32>
    %204 = math.exp %203 : vector<2x32xf32>
    %cst_61 = arith.constant 1.000000e+00 : f32
    %205 = vector.broadcast %cst_61 : f32 to vector<2x32xf32>
    %206 = arith.addf %205, %204 : vector<2x32xf32>
    %207 = arith.divf %205, %206 : vector<2x32xf32>
    %208 = vector.extract_strided_slice %198 {offsets = [0, 32], sizes = [2, 32], strides = [1, 1]} : vector<2x96xf32> to vector<2x32xf32>
    %209 = vector.extract_strided_slice %199 {offsets = [0, 32], sizes = [2, 32], strides = [1, 1]} : vector<2x96xf32> to vector<2x32xf32>
    %210 = arith.addf %208, %209 : vector<2x32xf32>
    %211 = arith.negf %210 : vector<2x32xf32>
    %212 = math.exp %211 : vector<2x32xf32>
    %cst_62 = arith.constant 1.000000e+00 : f32
    %213 = vector.broadcast %cst_62 : f32 to vector<2x32xf32>
    %214 = arith.addf %213, %212 : vector<2x32xf32>
    %215 = arith.divf %213, %214 : vector<2x32xf32>
    %216 = vector.extract_strided_slice %198 {offsets = [0, 64], sizes = [2, 32], strides = [1, 1]} : vector<2x96xf32> to vector<2x32xf32>
    %217 = vector.extract_strided_slice %199 {offsets = [0, 64], sizes = [2, 32], strides = [1, 1]} : vector<2x96xf32> to vector<2x32xf32>
    %218 = vector.broadcast %6 : vector<1x32xf32> to vector<2x32xf32>
    %219 = arith.addf %217, %218 : vector<2x32xf32>
    %220 = arith.mulf %207, %219 : vector<2x32xf32>
    %221 = arith.addf %216, %220 : vector<2x32xf32>
    %222 = math.tanh %221 : vector<2x32xf32>
    %cst_63 = arith.constant 1.000000e+00 : f32
    %223 = vector.broadcast %cst_63 : f32 to vector<2x32xf32>
    %224 = arith.subf %223, %215 : vector<2x32xf32>
    %225 = arith.mulf %224, %222 : vector<2x32xf32>
    %226 = arith.mulf %215, %191 : vector<2x32xf32>
    %227 = arith.addf %225, %226 : vector<2x32xf32>
    %228 = arith.index_cast %c5_i32 : i32 to index
    %c0_64 = arith.constant 0 : index
    %c0_65 = arith.constant 0 : index
    %229 = vector.load %arg13[%228, %c0_64, %c0_65] : memref<8x2x32xf32, #tpu.memory_space<vmem>>, vector<1x2x32xf32>
    %230 = vector.shape_cast %229 : vector<1x2x32xf32> to vector<2x32xf32>
    %231 = vector.shape_cast %227 : vector<2x32xf32> to vector<1x2x32xf32>
    tpu.vector_store %arg13[%228, %c0_64, %c0_65], %231 {strides = array<i32>} : memref<8x2x32xf32, #tpu.memory_space<vmem>>, vector<1x2x32xf32>,
    %c6_i32 = arith.constant 6 : i32
    %232 = arith.index_cast %c6_i32 : i32 to index
    %c0_66 = arith.constant 0 : index
    %c0_67 = arith.constant 0 : index
    %233 = vector.load %arg14[%232, %c0_66, %c0_67] : memref<8x2x96xf32, #tpu.memory_space<vmem>>, vector<1x2x96xf32>
    %234 = vector.shape_cast %233 : vector<1x2x96xf32> to vector<2x96xf32>
    %cst_68 = arith.constant dense<0.000000e+00> : vector<2x96xf32>
    %235 = tpu.matmul %227, %4, %cst_68 {dimension_numbers = #tpu.dot_dimension_numbers<[1], [0], [0], [1], [0, 0, 1, 1], [], []>} : vector<2x32xf32>, vector<32x96xf32>, vector<2x96xf32> -> vector<2x96xf32>
    %236 = vector.extract_strided_slice %234 {offsets = [0, 0], sizes = [2, 32], strides = [1, 1]} : vector<2x96xf32> to vector<2x32xf32>
    %237 = vector.extract_strided_slice %235 {offsets = [0, 0], sizes = [2, 32], strides = [1, 1]} : vector<2x96xf32> to vector<2x32xf32>
    %238 = arith.addf %236, %237 : vector<2x32xf32>
    %239 = arith.negf %238 : vector<2x32xf32>
    %240 = math.exp %239 : vector<2x32xf32>
    %cst_69 = arith.constant 1.000000e+00 : f32
    %241 = vector.broadcast %cst_69 : f32 to vector<2x32xf32>
    %242 = arith.addf %241, %240 : vector<2x32xf32>
    %243 = arith.divf %241, %242 : vector<2x32xf32>
    %244 = vector.extract_strided_slice %234 {offsets = [0, 32], sizes = [2, 32], strides = [1, 1]} : vector<2x96xf32> to vector<2x32xf32>
    %245 = vector.extract_strided_slice %235 {offsets = [0, 32], sizes = [2, 32], strides = [1, 1]} : vector<2x96xf32> to vector<2x32xf32>
    %246 = arith.addf %244, %245 : vector<2x32xf32>
    %247 = arith.negf %246 : vector<2x32xf32>
    %248 = math.exp %247 : vector<2x32xf32>
    %cst_70 = arith.constant 1.000000e+00 : f32
    %249 = vector.broadcast %cst_70 : f32 to vector<2x32xf32>
    %250 = arith.addf %249, %248 : vector<2x32xf32>
    %251 = arith.divf %249, %250 : vector<2x32xf32>
    %252 = vector.extract_strided_slice %234 {offsets = [0, 64], sizes = [2, 32], strides = [1, 1]} : vector<2x96xf32> to vector<2x32xf32>
    %253 = vector.extract_strided_slice %235 {offsets = [0, 64], sizes = [2, 32], strides = [1, 1]} : vector<2x96xf32> to vector<2x32xf32>
    %254 = vector.broadcast %6 : vector<1x32xf32> to vector<2x32xf32>
    %255 = arith.addf %253, %254 : vector<2x32xf32>
    %256 = arith.mulf %243, %255 : vector<2x32xf32>
    %257 = arith.addf %252, %256 : vector<2x32xf32>
    %258 = math.tanh %257 : vector<2x32xf32>
    %cst_71 = arith.constant 1.000000e+00 : f32
    %259 = vector.broadcast %cst_71 : f32 to vector<2x32xf32>
    %260 = arith.subf %259, %251 : vector<2x32xf32>
    %261 = arith.mulf %260, %258 : vector<2x32xf32>
    %262 = arith.mulf %251, %227 : vector<2x32xf32>
    %263 = arith.addf %261, %262 : vector<2x32xf32>
    %264 = arith.index_cast %c6_i32 : i32 to index
    %c0_72 = arith.constant 0 : index
    %c0_73 = arith.constant 0 : index
    %265 = vector.load %arg13[%264, %c0_72, %c0_73] : memref<8x2x32xf32, #tpu.memory_space<vmem>>, vector<1x2x32xf32>
    %266 = vector.shape_cast %265 : vector<1x2x32xf32> to vector<2x32xf32>
    %267 = vector.shape_cast %263 : vector<2x32xf32> to vector<1x2x32xf32>
    tpu.vector_store %arg13[%264, %c0_72, %c0_73], %267 {strides = array<i32>} : memref<8x2x32xf32, #tpu.memory_space<vmem>>, vector<1x2x32xf32>,
    %c7_i32 = arith.constant 7 : i32
    %268 = arith.index_cast %c7_i32 : i32 to index
    %c0_74 = arith.constant 0 : index
    %c0_75 = arith.constant 0 : index
    %269 = vector.load %arg14[%268, %c0_74, %c0_75] : memref<8x2x96xf32, #tpu.memory_space<vmem>>, vector<1x2x96xf32>
    %270 = vector.shape_cast %269 : vector<1x2x96xf32> to vector<2x96xf32>
    %cst_76 = arith.constant dense<0.000000e+00> : vector<2x96xf32>
    %271 = tpu.matmul %263, %4, %cst_76 {dimension_numbers = #tpu.dot_dimension_numbers<[1], [0], [0], [1], [0, 0, 1, 1], [], []>} : vector<2x32xf32>, vector<32x96xf32>, vector<2x96xf32> -> vector<2x96xf32>
    %272 = vector.extract_strided_slice %270 {offsets = [0, 0], sizes = [2, 32], strides = [1, 1]} : vector<2x96xf32> to vector<2x32xf32>
    %273 = vector.extract_strided_slice %271 {offsets = [0, 0], sizes = [2, 32], strides = [1, 1]} : vector<2x96xf32> to vector<2x32xf32>
    %274 = arith.addf %272, %273 : vector<2x32xf32>
    %275 = arith.negf %274 : vector<2x32xf32>
    %276 = math.exp %275 : vector<2x32xf32>
    %cst_77 = arith.constant 1.000000e+00 : f32
    %277 = vector.broadcast %cst_77 : f32 to vector<2x32xf32>
    %278 = arith.addf %277, %276 : vector<2x32xf32>
    %279 = arith.divf %277, %278 : vector<2x32xf32>
    %280 = vector.extract_strided_slice %270 {offsets = [0, 32], sizes = [2, 32], strides = [1, 1]} : vector<2x96xf32> to vector<2x32xf32>
    %281 = vector.extract_strided_slice %271 {offsets = [0, 32], sizes = [2, 32], strides = [1, 1]} : vector<2x96xf32> to vector<2x32xf32>
    %282 = arith.addf %280, %281 : vector<2x32xf32>
    %283 = arith.negf %282 : vector<2x32xf32>
    %284 = math.exp %283 : vector<2x32xf32>
    %cst_78 = arith.constant 1.000000e+00 : f32
    %285 = vector.broadcast %cst_78 : f32 to vector<2x32xf32>
    %286 = arith.addf %285, %284 : vector<2x32xf32>
    %287 = arith.divf %285, %286 : vector<2x32xf32>
    %288 = vector.extract_strided_slice %270 {offsets = [0, 64], sizes = [2, 32], strides = [1, 1]} : vector<2x96xf32> to vector<2x32xf32>
    %289 = vector.extract_strided_slice %271 {offsets = [0, 64], sizes = [2, 32], strides = [1, 1]} : vector<2x96xf32> to vector<2x32xf32>
    %290 = vector.broadcast %6 : vector<1x32xf32> to vector<2x32xf32>
    %291 = arith.addf %289, %290 : vector<2x32xf32>
    %292 = arith.mulf %279, %291 : vector<2x32xf32>
    %293 = arith.addf %288, %292 : vector<2x32xf32>
    %294 = math.tanh %293 : vector<2x32xf32>
    %cst_79 = arith.constant 1.000000e+00 : f32
    %295 = vector.broadcast %cst_79 : f32 to vector<2x32xf32>
    %296 = arith.subf %295, %287 : vector<2x32xf32>
    %297 = arith.mulf %296, %294 : vector<2x32xf32>
    %298 = arith.mulf %287, %263 : vector<2x32xf32>
    %299 = arith.addf %297, %298 : vector<2x32xf32>
    %300 = arith.index_cast %c7_i32 : i32 to index
    %c0_80 = arith.constant 0 : index
    %c0_81 = arith.constant 0 : index
    %301 = vector.load %arg13[%300, %c0_80, %c0_81] : memref<8x2x32xf32, #tpu.memory_space<vmem>>, vector<1x2x32xf32>
    %302 = vector.shape_cast %301 : vector<1x2x32xf32> to vector<2x32xf32>
    %303 = vector.shape_cast %299 : vector<2x32xf32> to vector<1x2x32xf32>
    tpu.vector_store %arg13[%300, %c0_80, %c0_81], %303 {strides = array<i32>} : memref<8x2x32xf32, #tpu.memory_space<vmem>>, vector<1x2x32xf32>,
    %c8_i32 = arith.constant 8 : i32
    %c0_82 = arith.constant 0 : index
    %c0_83 = arith.constant 0 : index
    %c0_84 = arith.constant 0 : index
    %304 = vector.load %arg12[%c0_82, %c0_83, %c0_84] : memref<2x2x32xf32, #tpu.memory_space<vmem>>, vector<1x2x32xf32>
    %305 = vector.shape_cast %304 : vector<1x2x32xf32> to vector<2x32xf32>
    %306 = vector.shape_cast %299 : vector<2x32xf32> to vector<1x2x32xf32>
    tpu.vector_store %arg12[%c0_82, %c0_83, %c0_84], %306 {strides = array<i32>} : memref<2x2x32xf32, #tpu.memory_space<vmem>>, vector<1x2x32xf32>,
    %c0_85 = arith.constant 0 : index
    %c0_86 = arith.constant 0 : index
    %307 = vector.load %arg6[%c0_85, %c0_86] : memref<32x96xf32, #tpu.memory_space<vmem>>, vector<32x96xf32>
    %c0_87 = arith.constant 0 : index
    %c0_88 = arith.constant 0 : index
    %308 = vector.load %arg7[%c0_87, %c0_88] : memref<32x96xf32, #tpu.memory_space<vmem>>, vector<32x96xf32>
    %c0_89 = arith.constant 0 : index
    %c0_90 = arith.constant 0 : index
    %309 = vector.load %arg8[%c0_89, %c0_90] : memref<1x96xf32, #tpu.memory_space<vmem>>, vector<1x96xf32>
    %c0_91 = arith.constant 0 : index
    %c0_92 = arith.constant 0 : index
    %310 = vector.load %arg9[%c0_91, %c0_92] : memref<1x32xf32, #tpu.memory_space<vmem>>, vector<1x32xf32>
    %c0_93 = arith.constant 0 : index
    %c0_94 = arith.constant 0 : index
    %c0_95 = arith.constant 0 : index
    %311 = vector.load %arg13[%c0_93, %c0_94, %c0_95] : memref<8x2x32xf32, #tpu.memory_space<vmem>>, vector<8x2x32xf32>
    %312 = vector.shape_cast %311 : vector<8x2x32xf32> to vector<16x32xf32>
    %cst_96 = arith.constant dense<0.000000e+00> : vector<16x96xf32>
    %313 = tpu.matmul %312, %307, %cst_96 {dimension_numbers = #tpu.dot_dimension_numbers<[1], [0], [0], [1], [0, 0, 1, 1], [], []>} : vector<16x32xf32>, vector<32x96xf32>, vector<16x96xf32> -> vector<16x96xf32>
    %314 = vector.broadcast %309 : vector<1x96xf32> to vector<16x96xf32>
    %315 = arith.addf %313, %314 : vector<16x96xf32>
    %316 = vector.shape_cast %315 : vector<16x96xf32> to vector<8x2x96xf32>
    %c0_97 = arith.constant 0 : index
    %c0_98 = arith.constant 0 : index
    %c0_99 = arith.constant 0 : index
    %317 = vector.load %arg14[%c0_97, %c0_98, %c0_99] : memref<8x2x96xf32, #tpu.memory_space<vmem>>, vector<8x2x96xf32>
    tpu.vector_store %arg14[%c0_97, %c0_98, %c0_99], %316 {strides = array<i32>} : memref<8x2x96xf32, #tpu.memory_space<vmem>>, vector<8x2x96xf32>,
    %c1 = arith.constant 1 : index
    %c0_100 = arith.constant 0 : index
    %c0_101 = arith.constant 0 : index
    %318 = vector.load %arg12[%c1, %c0_100, %c0_101] : memref<2x2x32xf32, #tpu.memory_space<vmem>>, vector<1x2x32xf32>
    %319 = vector.shape_cast %318 : vector<1x2x32xf32> to vector<2x32xf32>
    %c0_i32_102 = arith.constant 0 : i32
    %320 = arith.index_cast %c0_i32_102 : i32 to index
    %c0_103 = arith.constant 0 : index
    %c0_104 = arith.constant 0 : index
    %321 = vector.load %arg14[%320, %c0_103, %c0_104] : memref<8x2x96xf32, #tpu.memory_space<vmem>>, vector<1x2x96xf32>
    %322 = vector.shape_cast %321 : vector<1x2x96xf32> to vector<2x96xf32>
    %cst_105 = arith.constant dense<0.000000e+00> : vector<2x96xf32>
    %323 = tpu.matmul %319, %308, %cst_105 {dimension_numbers = #tpu.dot_dimension_numbers<[1], [0], [0], [1], [0, 0, 1, 1], [], []>} : vector<2x32xf32>, vector<32x96xf32>, vector<2x96xf32> -> vector<2x96xf32>
    %324 = vector.extract_strided_slice %322 {offsets = [0, 0], sizes = [2, 32], strides = [1, 1]} : vector<2x96xf32> to vector<2x32xf32>
    %325 = vector.extract_strided_slice %323 {offsets = [0, 0], sizes = [2, 32], strides = [1, 1]} : vector<2x96xf32> to vector<2x32xf32>
    %326 = arith.addf %324, %325 : vector<2x32xf32>
    %327 = arith.negf %326 : vector<2x32xf32>
    %328 = math.exp %327 : vector<2x32xf32>
    %cst_106 = arith.constant 1.000000e+00 : f32
    %329 = vector.broadcast %cst_106 : f32 to vector<2x32xf32>
    %330 = arith.addf %329, %328 : vector<2x32xf32>
    %331 = arith.divf %329, %330 : vector<2x32xf32>
    %332 = vector.extract_strided_slice %322 {offsets = [0, 32], sizes = [2, 32], strides = [1, 1]} : vector<2x96xf32> to vector<2x32xf32>
    %333 = vector.extract_strided_slice %323 {offsets = [0, 32], sizes = [2, 32], strides = [1, 1]} : vector<2x96xf32> to vector<2x32xf32>
    %334 = arith.addf %332, %333 : vector<2x32xf32>
    %335 = arith.negf %334 : vector<2x32xf32>
    %336 = math.exp %335 : vector<2x32xf32>
    %cst_107 = arith.constant 1.000000e+00 : f32
    %337 = vector.broadcast %cst_107 : f32 to vector<2x32xf32>
    %338 = arith.addf %337, %336 : vector<2x32xf32>
    %339 = arith.divf %337, %338 : vector<2x32xf32>
    %340 = vector.extract_strided_slice %322 {offsets = [0, 64], sizes = [2, 32], strides = [1, 1]} : vector<2x96xf32> to vector<2x32xf32>
    %341 = vector.extract_strided_slice %323 {offsets = [0, 64], sizes = [2, 32], strides = [1, 1]} : vector<2x96xf32> to vector<2x32xf32>
    %342 = vector.broadcast %310 : vector<1x32xf32> to vector<2x32xf32>
    %343 = arith.addf %341, %342 : vector<2x32xf32>
    %344 = arith.mulf %331, %343 : vector<2x32xf32>
    %345 = arith.addf %340, %344 : vector<2x32xf32>
    %346 = math.tanh %345 : vector<2x32xf32>
    %cst_108 = arith.constant 1.000000e+00 : f32
    %347 = vector.broadcast %cst_108 : f32 to vector<2x32xf32>
    %348 = arith.subf %347, %339 : vector<2x32xf32>
    %349 = arith.mulf %348, %346 : vector<2x32xf32>
    %350 = arith.mulf %339, %319 : vector<2x32xf32>
    %351 = arith.addf %349, %350 : vector<2x32xf32>
    %352 = arith.index_cast %c0_i32_102 : i32 to index
    %c0_109 = arith.constant 0 : index
    %c0_110 = arith.constant 0 : index
    %353 = vector.load %arg10[%352, %c0_109, %c0_110] : memref<8x2x32xf32, #tpu.memory_space<vmem>>, vector<1x2x32xf32>
    %354 = vector.shape_cast %353 : vector<1x2x32xf32> to vector<2x32xf32>
    %355 = vector.shape_cast %351 : vector<2x32xf32> to vector<1x2x32xf32>
    tpu.vector_store %arg10[%352, %c0_109, %c0_110], %355 {strides = array<i32>} : memref<8x2x32xf32, #tpu.memory_space<vmem>>, vector<1x2x32xf32>,
    %c1_i32_111 = arith.constant 1 : i32
    %356 = arith.index_cast %c1_i32_111 : i32 to index
    %c0_112 = arith.constant 0 : index
    %c0_113 = arith.constant 0 : index
    %357 = vector.load %arg14[%356, %c0_112, %c0_113] : memref<8x2x96xf32, #tpu.memory_space<vmem>>, vector<1x2x96xf32>
    %358 = vector.shape_cast %357 : vector<1x2x96xf32> to vector<2x96xf32>
    %cst_114 = arith.constant dense<0.000000e+00> : vector<2x96xf32>
    %359 = tpu.matmul %351, %308, %cst_114 {dimension_numbers = #tpu.dot_dimension_numbers<[1], [0], [0], [1], [0, 0, 1, 1], [], []>} : vector<2x32xf32>, vector<32x96xf32>, vector<2x96xf32> -> vector<2x96xf32>
    %360 = vector.extract_strided_slice %358 {offsets = [0, 0], sizes = [2, 32], strides = [1, 1]} : vector<2x96xf32> to vector<2x32xf32>
    %361 = vector.extract_strided_slice %359 {offsets = [0, 0], sizes = [2, 32], strides = [1, 1]} : vector<2x96xf32> to vector<2x32xf32>
    %362 = arith.addf %360, %361 : vector<2x32xf32>
    %363 = arith.negf %362 : vector<2x32xf32>
    %364 = math.exp %363 : vector<2x32xf32>
    %cst_115 = arith.constant 1.000000e+00 : f32
    %365 = vector.broadcast %cst_115 : f32 to vector<2x32xf32>
    %366 = arith.addf %365, %364 : vector<2x32xf32>
    %367 = arith.divf %365, %366 : vector<2x32xf32>
    %368 = vector.extract_strided_slice %358 {offsets = [0, 32], sizes = [2, 32], strides = [1, 1]} : vector<2x96xf32> to vector<2x32xf32>
    %369 = vector.extract_strided_slice %359 {offsets = [0, 32], sizes = [2, 32], strides = [1, 1]} : vector<2x96xf32> to vector<2x32xf32>
    %370 = arith.addf %368, %369 : vector<2x32xf32>
    %371 = arith.negf %370 : vector<2x32xf32>
    %372 = math.exp %371 : vector<2x32xf32>
    %cst_116 = arith.constant 1.000000e+00 : f32
    %373 = vector.broadcast %cst_116 : f32 to vector<2x32xf32>
    %374 = arith.addf %373, %372 : vector<2x32xf32>
    %375 = arith.divf %373, %374 : vector<2x32xf32>
    %376 = vector.extract_strided_slice %358 {offsets = [0, 64], sizes = [2, 32], strides = [1, 1]} : vector<2x96xf32> to vector<2x32xf32>
    %377 = vector.extract_strided_slice %359 {offsets = [0, 64], sizes = [2, 32], strides = [1, 1]} : vector<2x96xf32> to vector<2x32xf32>
    %378 = vector.broadcast %310 : vector<1x32xf32> to vector<2x32xf32>
    %379 = arith.addf %377, %378 : vector<2x32xf32>
    %380 = arith.mulf %367, %379 : vector<2x32xf32>
    %381 = arith.addf %376, %380 : vector<2x32xf32>
    %382 = math.tanh %381 : vector<2x32xf32>
    %cst_117 = arith.constant 1.000000e+00 : f32
    %383 = vector.broadcast %cst_117 : f32 to vector<2x32xf32>
    %384 = arith.subf %383, %375 : vector<2x32xf32>
    %385 = arith.mulf %384, %382 : vector<2x32xf32>
    %386 = arith.mulf %375, %351 : vector<2x32xf32>
    %387 = arith.addf %385, %386 : vector<2x32xf32>
    %388 = arith.index_cast %c1_i32_111 : i32 to index
    %c0_118 = arith.constant 0 : index
    %c0_119 = arith.constant 0 : index
    %389 = vector.load %arg10[%388, %c0_118, %c0_119] : memref<8x2x32xf32, #tpu.memory_space<vmem>>, vector<1x2x32xf32>
    %390 = vector.shape_cast %389 : vector<1x2x32xf32> to vector<2x32xf32>
    %391 = vector.shape_cast %387 : vector<2x32xf32> to vector<1x2x32xf32>
    tpu.vector_store %arg10[%388, %c0_118, %c0_119], %391 {strides = array<i32>} : memref<8x2x32xf32, #tpu.memory_space<vmem>>, vector<1x2x32xf32>,
    %c2_i32_120 = arith.constant 2 : i32
    %392 = arith.index_cast %c2_i32_120 : i32 to index
    %c0_121 = arith.constant 0 : index
    %c0_122 = arith.constant 0 : index
    %393 = vector.load %arg14[%392, %c0_121, %c0_122] : memref<8x2x96xf32, #tpu.memory_space<vmem>>, vector<1x2x96xf32>
    %394 = vector.shape_cast %393 : vector<1x2x96xf32> to vector<2x96xf32>
    %cst_123 = arith.constant dense<0.000000e+00> : vector<2x96xf32>
    %395 = tpu.matmul %387, %308, %cst_123 {dimension_numbers = #tpu.dot_dimension_numbers<[1], [0], [0], [1], [0, 0, 1, 1], [], []>} : vector<2x32xf32>, vector<32x96xf32>, vector<2x96xf32> -> vector<2x96xf32>
    %396 = vector.extract_strided_slice %394 {offsets = [0, 0], sizes = [2, 32], strides = [1, 1]} : vector<2x96xf32> to vector<2x32xf32>
    %397 = vector.extract_strided_slice %395 {offsets = [0, 0], sizes = [2, 32], strides = [1, 1]} : vector<2x96xf32> to vector<2x32xf32>
    %398 = arith.addf %396, %397 : vector<2x32xf32>
    %399 = arith.negf %398 : vector<2x32xf32>
    %400 = math.exp %399 : vector<2x32xf32>
    %cst_124 = arith.constant 1.000000e+00 : f32
    %401 = vector.broadcast %cst_124 : f32 to vector<2x32xf32>
    %402 = arith.addf %401, %400 : vector<2x32xf32>
    %403 = arith.divf %401, %402 : vector<2x32xf32>
    %404 = vector.extract_strided_slice %394 {offsets = [0, 32], sizes = [2, 32], strides = [1, 1]} : vector<2x96xf32> to vector<2x32xf32>
    %405 = vector.extract_strided_slice %395 {offsets = [0, 32], sizes = [2, 32], strides = [1, 1]} : vector<2x96xf32> to vector<2x32xf32>
    %406 = arith.addf %404, %405 : vector<2x32xf32>
    %407 = arith.negf %406 : vector<2x32xf32>
    %408 = math.exp %407 : vector<2x32xf32>
    %cst_125 = arith.constant 1.000000e+00 : f32
    %409 = vector.broadcast %cst_125 : f32 to vector<2x32xf32>
    %410 = arith.addf %409, %408 : vector<2x32xf32>
    %411 = arith.divf %409, %410 : vector<2x32xf32>
    %412 = vector.extract_strided_slice %394 {offsets = [0, 64], sizes = [2, 32], strides = [1, 1]} : vector<2x96xf32> to vector<2x32xf32>
    %413 = vector.extract_strided_slice %395 {offsets = [0, 64], sizes = [2, 32], strides = [1, 1]} : vector<2x96xf32> to vector<2x32xf32>
    %414 = vector.broadcast %310 : vector<1x32xf32> to vector<2x32xf32>
    %415 = arith.addf %413, %414 : vector<2x32xf32>
    %416 = arith.mulf %403, %415 : vector<2x32xf32>
    %417 = arith.addf %412, %416 : vector<2x32xf32>
    %418 = math.tanh %417 : vector<2x32xf32>
    %cst_126 = arith.constant 1.000000e+00 : f32
    %419 = vector.broadcast %cst_126 : f32 to vector<2x32xf32>
    %420 = arith.subf %419, %411 : vector<2x32xf32>
    %421 = arith.mulf %420, %418 : vector<2x32xf32>
    %422 = arith.mulf %411, %387 : vector<2x32xf32>
    %423 = arith.addf %421, %422 : vector<2x32xf32>
    %424 = arith.index_cast %c2_i32_120 : i32 to index
    %c0_127 = arith.constant 0 : index
    %c0_128 = arith.constant 0 : index
    %425 = vector.load %arg10[%424, %c0_127, %c0_128] : memref<8x2x32xf32, #tpu.memory_space<vmem>>, vector<1x2x32xf32>
    %426 = vector.shape_cast %425 : vector<1x2x32xf32> to vector<2x32xf32>
    %427 = vector.shape_cast %423 : vector<2x32xf32> to vector<1x2x32xf32>
    tpu.vector_store %arg10[%424, %c0_127, %c0_128], %427 {strides = array<i32>} : memref<8x2x32xf32, #tpu.memory_space<vmem>>, vector<1x2x32xf32>,
    %c3_i32_129 = arith.constant 3 : i32
    %428 = arith.index_cast %c3_i32_129 : i32 to index
    %c0_130 = arith.constant 0 : index
    %c0_131 = arith.constant 0 : index
    %429 = vector.load %arg14[%428, %c0_130, %c0_131] : memref<8x2x96xf32, #tpu.memory_space<vmem>>, vector<1x2x96xf32>
    %430 = vector.shape_cast %429 : vector<1x2x96xf32> to vector<2x96xf32>
    %cst_132 = arith.constant dense<0.000000e+00> : vector<2x96xf32>
    %431 = tpu.matmul %423, %308, %cst_132 {dimension_numbers = #tpu.dot_dimension_numbers<[1], [0], [0], [1], [0, 0, 1, 1], [], []>} : vector<2x32xf32>, vector<32x96xf32>, vector<2x96xf32> -> vector<2x96xf32>
    %432 = vector.extract_strided_slice %430 {offsets = [0, 0], sizes = [2, 32], strides = [1, 1]} : vector<2x96xf32> to vector<2x32xf32>
    %433 = vector.extract_strided_slice %431 {offsets = [0, 0], sizes = [2, 32], strides = [1, 1]} : vector<2x96xf32> to vector<2x32xf32>
    %434 = arith.addf %432, %433 : vector<2x32xf32>
    %435 = arith.negf %434 : vector<2x32xf32>
    %436 = math.exp %435 : vector<2x32xf32>
    %cst_133 = arith.constant 1.000000e+00 : f32
    %437 = vector.broadcast %cst_133 : f32 to vector<2x32xf32>
    %438 = arith.addf %437, %436 : vector<2x32xf32>
    %439 = arith.divf %437, %438 : vector<2x32xf32>
    %440 = vector.extract_strided_slice %430 {offsets = [0, 32], sizes = [2, 32], strides = [1, 1]} : vector<2x96xf32> to vector<2x32xf32>
    %441 = vector.extract_strided_slice %431 {offsets = [0, 32], sizes = [2, 32], strides = [1, 1]} : vector<2x96xf32> to vector<2x32xf32>
    %442 = arith.addf %440, %441 : vector<2x32xf32>
    %443 = arith.negf %442 : vector<2x32xf32>
    %444 = math.exp %443 : vector<2x32xf32>
    %cst_134 = arith.constant 1.000000e+00 : f32
    %445 = vector.broadcast %cst_134 : f32 to vector<2x32xf32>
    %446 = arith.addf %445, %444 : vector<2x32xf32>
    %447 = arith.divf %445, %446 : vector<2x32xf32>
    %448 = vector.extract_strided_slice %430 {offsets = [0, 64], sizes = [2, 32], strides = [1, 1]} : vector<2x96xf32> to vector<2x32xf32>
    %449 = vector.extract_strided_slice %431 {offsets = [0, 64], sizes = [2, 32], strides = [1, 1]} : vector<2x96xf32> to vector<2x32xf32>
    %450 = vector.broadcast %310 : vector<1x32xf32> to vector<2x32xf32>
    %451 = arith.addf %449, %450 : vector<2x32xf32>
    %452 = arith.mulf %439, %451 : vector<2x32xf32>
    %453 = arith.addf %448, %452 : vector<2x32xf32>
    %454 = math.tanh %453 : vector<2x32xf32>
    %cst_135 = arith.constant 1.000000e+00 : f32
    %455 = vector.broadcast %cst_135 : f32 to vector<2x32xf32>
    %456 = arith.subf %455, %447 : vector<2x32xf32>
    %457 = arith.mulf %456, %454 : vector<2x32xf32>
    %458 = arith.mulf %447, %423 : vector<2x32xf32>
    %459 = arith.addf %457, %458 : vector<2x32xf32>
    %460 = arith.index_cast %c3_i32_129 : i32 to index
    %c0_136 = arith.constant 0 : index
    %c0_137 = arith.constant 0 : index
    %461 = vector.load %arg10[%460, %c0_136, %c0_137] : memref<8x2x32xf32, #tpu.memory_space<vmem>>, vector<1x2x32xf32>
    %462 = vector.shape_cast %461 : vector<1x2x32xf32> to vector<2x32xf32>
    %463 = vector.shape_cast %459 : vector<2x32xf32> to vector<1x2x32xf32>
    tpu.vector_store %arg10[%460, %c0_136, %c0_137], %463 {strides = array<i32>} : memref<8x2x32xf32, #tpu.memory_space<vmem>>, vector<1x2x32xf32>,
    %c4_i32_138 = arith.constant 4 : i32
    %464 = arith.index_cast %c4_i32_138 : i32 to index
    %c0_139 = arith.constant 0 : index
    %c0_140 = arith.constant 0 : index
    %465 = vector.load %arg14[%464, %c0_139, %c0_140] : memref<8x2x96xf32, #tpu.memory_space<vmem>>, vector<1x2x96xf32>
    %466 = vector.shape_cast %465 : vector<1x2x96xf32> to vector<2x96xf32>
    %cst_141 = arith.constant dense<0.000000e+00> : vector<2x96xf32>
    %467 = tpu.matmul %459, %308, %cst_141 {dimension_numbers = #tpu.dot_dimension_numbers<[1], [0], [0], [1], [0, 0, 1, 1], [], []>} : vector<2x32xf32>, vector<32x96xf32>, vector<2x96xf32> -> vector<2x96xf32>
    %468 = vector.extract_strided_slice %466 {offsets = [0, 0], sizes = [2, 32], strides = [1, 1]} : vector<2x96xf32> to vector<2x32xf32>
    %469 = vector.extract_strided_slice %467 {offsets = [0, 0], sizes = [2, 32], strides = [1, 1]} : vector<2x96xf32> to vector<2x32xf32>
    %470 = arith.addf %468, %469 : vector<2x32xf32>
    %471 = arith.negf %470 : vector<2x32xf32>
    %472 = math.exp %471 : vector<2x32xf32>
    %cst_142 = arith.constant 1.000000e+00 : f32
    %473 = vector.broadcast %cst_142 : f32 to vector<2x32xf32>
    %474 = arith.addf %473, %472 : vector<2x32xf32>
    %475 = arith.divf %473, %474 : vector<2x32xf32>
    %476 = vector.extract_strided_slice %466 {offsets = [0, 32], sizes = [2, 32], strides = [1, 1]} : vector<2x96xf32> to vector<2x32xf32>
    %477 = vector.extract_strided_slice %467 {offsets = [0, 32], sizes = [2, 32], strides = [1, 1]} : vector<2x96xf32> to vector<2x32xf32>
    %478 = arith.addf %476, %477 : vector<2x32xf32>
    %479 = arith.negf %478 : vector<2x32xf32>
    %480 = math.exp %479 : vector<2x32xf32>
    %cst_143 = arith.constant 1.000000e+00 : f32
    %481 = vector.broadcast %cst_143 : f32 to vector<2x32xf32>
    %482 = arith.addf %481, %480 : vector<2x32xf32>
    %483 = arith.divf %481, %482 : vector<2x32xf32>
    %484 = vector.extract_strided_slice %466 {offsets = [0, 64], sizes = [2, 32], strides = [1, 1]} : vector<2x96xf32> to vector<2x32xf32>
    %485 = vector.extract_strided_slice %467 {offsets = [0, 64], sizes = [2, 32], strides = [1, 1]} : vector<2x96xf32> to vector<2x32xf32>
    %486 = vector.broadcast %310 : vector<1x32xf32> to vector<2x32xf32>
    %487 = arith.addf %485, %486 : vector<2x32xf32>
    %488 = arith.mulf %475, %487 : vector<2x32xf32>
    %489 = arith.addf %484, %488 : vector<2x32xf32>
    %490 = math.tanh %489 : vector<2x32xf32>
    %cst_144 = arith.constant 1.000000e+00 : f32
    %491 = vector.broadcast %cst_144 : f32 to vector<2x32xf32>
    %492 = arith.subf %491, %483 : vector<2x32xf32>
    %493 = arith.mulf %492, %490 : vector<2x32xf32>
    %494 = arith.mulf %483, %459 : vector<2x32xf32>
    %495 = arith.addf %493, %494 : vector<2x32xf32>
    %496 = arith.index_cast %c4_i32_138 : i32 to index
    %c0_145 = arith.constant 0 : index
    %c0_146 = arith.constant 0 : index
    %497 = vector.load %arg10[%496, %c0_145, %c0_146] : memref<8x2x32xf32, #tpu.memory_space<vmem>>, vector<1x2x32xf32>
    %498 = vector.shape_cast %497 : vector<1x2x32xf32> to vector<2x32xf32>
    %499 = vector.shape_cast %495 : vector<2x32xf32> to vector<1x2x32xf32>
    tpu.vector_store %arg10[%496, %c0_145, %c0_146], %499 {strides = array<i32>} : memref<8x2x32xf32, #tpu.memory_space<vmem>>, vector<1x2x32xf32>,
    %c5_i32_147 = arith.constant 5 : i32
    %500 = arith.index_cast %c5_i32_147 : i32 to index
    %c0_148 = arith.constant 0 : index
    %c0_149 = arith.constant 0 : index
    %501 = vector.load %arg14[%500, %c0_148, %c0_149] : memref<8x2x96xf32, #tpu.memory_space<vmem>>, vector<1x2x96xf32>
    %502 = vector.shape_cast %501 : vector<1x2x96xf32> to vector<2x96xf32>
    %cst_150 = arith.constant dense<0.000000e+00> : vector<2x96xf32>
    %503 = tpu.matmul %495, %308, %cst_150 {dimension_numbers = #tpu.dot_dimension_numbers<[1], [0], [0], [1], [0, 0, 1, 1], [], []>} : vector<2x32xf32>, vector<32x96xf32>, vector<2x96xf32> -> vector<2x96xf32>
    %504 = vector.extract_strided_slice %502 {offsets = [0, 0], sizes = [2, 32], strides = [1, 1]} : vector<2x96xf32> to vector<2x32xf32>
    %505 = vector.extract_strided_slice %503 {offsets = [0, 0], sizes = [2, 32], strides = [1, 1]} : vector<2x96xf32> to vector<2x32xf32>
    %506 = arith.addf %504, %505 : vector<2x32xf32>
    %507 = arith.negf %506 : vector<2x32xf32>
    %508 = math.exp %507 : vector<2x32xf32>
    %cst_151 = arith.constant 1.000000e+00 : f32
    %509 = vector.broadcast %cst_151 : f32 to vector<2x32xf32>
    %510 = arith.addf %509, %508 : vector<2x32xf32>
    %511 = arith.divf %509, %510 : vector<2x32xf32>
    %512 = vector.extract_strided_slice %502 {offsets = [0, 32], sizes = [2, 32], strides = [1, 1]} : vector<2x96xf32> to vector<2x32xf32>
    %513 = vector.extract_strided_slice %503 {offsets = [0, 32], sizes = [2, 32], strides = [1, 1]} : vector<2x96xf32> to vector<2x32xf32>
    %514 = arith.addf %512, %513 : vector<2x32xf32>
    %515 = arith.negf %514 : vector<2x32xf32>
    %516 = math.exp %515 : vector<2x32xf32>
    %cst_152 = arith.constant 1.000000e+00 : f32
    %517 = vector.broadcast %cst_152 : f32 to vector<2x32xf32>
    %518 = arith.addf %517, %516 : vector<2x32xf32>
    %519 = arith.divf %517, %518 : vector<2x32xf32>
    %520 = vector.extract_strided_slice %502 {offsets = [0, 64], sizes = [2, 32], strides = [1, 1]} : vector<2x96xf32> to vector<2x32xf32>
    %521 = vector.extract_strided_slice %503 {offsets = [0, 64], sizes = [2, 32], strides = [1, 1]} : vector<2x96xf32> to vector<2x32xf32>
    %522 = vector.broadcast %310 : vector<1x32xf32> to vector<2x32xf32>
    %523 = arith.addf %521, %522 : vector<2x32xf32>
    %524 = arith.mulf %511, %523 : vector<2x32xf32>
    %525 = arith.addf %520, %524 : vector<2x32xf32>
    %526 = math.tanh %525 : vector<2x32xf32>
    %cst_153 = arith.constant 1.000000e+00 : f32
    %527 = vector.broadcast %cst_153 : f32 to vector<2x32xf32>
    %528 = arith.subf %527, %519 : vector<2x32xf32>
    %529 = arith.mulf %528, %526 : vector<2x32xf32>
    %530 = arith.mulf %519, %495 : vector<2x32xf32>
    %531 = arith.addf %529, %530 : vector<2x32xf32>
    %532 = arith.index_cast %c5_i32_147 : i32 to index
    %c0_154 = arith.constant 0 : index
    %c0_155 = arith.constant 0 : index
    %533 = vector.load %arg10[%532, %c0_154, %c0_155] : memref<8x2x32xf32, #tpu.memory_space<vmem>>, vector<1x2x32xf32>
    %534 = vector.shape_cast %533 : vector<1x2x32xf32> to vector<2x32xf32>
    %535 = vector.shape_cast %531 : vector<2x32xf32> to vector<1x2x32xf32>
    tpu.vector_store %arg10[%532, %c0_154, %c0_155], %535 {strides = array<i32>} : memref<8x2x32xf32, #tpu.memory_space<vmem>>, vector<1x2x32xf32>,
    %c6_i32_156 = arith.constant 6 : i32
    %536 = arith.index_cast %c6_i32_156 : i32 to index
    %c0_157 = arith.constant 0 : index
    %c0_158 = arith.constant 0 : index
    %537 = vector.load %arg14[%536, %c0_157, %c0_158] : memref<8x2x96xf32, #tpu.memory_space<vmem>>, vector<1x2x96xf32>
    %538 = vector.shape_cast %537 : vector<1x2x96xf32> to vector<2x96xf32>
    %cst_159 = arith.constant dense<0.000000e+00> : vector<2x96xf32>
    %539 = tpu.matmul %531, %308, %cst_159 {dimension_numbers = #tpu.dot_dimension_numbers<[1], [0], [0], [1], [0, 0, 1, 1], [], []>} : vector<2x32xf32>, vector<32x96xf32>, vector<2x96xf32> -> vector<2x96xf32>
    %540 = vector.extract_strided_slice %538 {offsets = [0, 0], sizes = [2, 32], strides = [1, 1]} : vector<2x96xf32> to vector<2x32xf32>
    %541 = vector.extract_strided_slice %539 {offsets = [0, 0], sizes = [2, 32], strides = [1, 1]} : vector<2x96xf32> to vector<2x32xf32>
    %542 = arith.addf %540, %541 : vector<2x32xf32>
    %543 = arith.negf %542 : vector<2x32xf32>
    %544 = math.exp %543 : vector<2x32xf32>
    %cst_160 = arith.constant 1.000000e+00 : f32
    %545 = vector.broadcast %cst_160 : f32 to vector<2x32xf32>
    %546 = arith.addf %545, %544 : vector<2x32xf32>
    %547 = arith.divf %545, %546 : vector<2x32xf32>
    %548 = vector.extract_strided_slice %538 {offsets = [0, 32], sizes = [2, 32], strides = [1, 1]} : vector<2x96xf32> to vector<2x32xf32>
    %549 = vector.extract_strided_slice %539 {offsets = [0, 32], sizes = [2, 32], strides = [1, 1]} : vector<2x96xf32> to vector<2x32xf32>
    %550 = arith.addf %548, %549 : vector<2x32xf32>
    %551 = arith.negf %550 : vector<2x32xf32>
    %552 = math.exp %551 : vector<2x32xf32>
    %cst_161 = arith.constant 1.000000e+00 : f32
    %553 = vector.broadcast %cst_161 : f32 to vector<2x32xf32>
    %554 = arith.addf %553, %552 : vector<2x32xf32>
    %555 = arith.divf %553, %554 : vector<2x32xf32>
    %556 = vector.extract_strided_slice %538 {offsets = [0, 64], sizes = [2, 32], strides = [1, 1]} : vector<2x96xf32> to vector<2x32xf32>
    %557 = vector.extract_strided_slice %539 {offsets = [0, 64], sizes = [2, 32], strides = [1, 1]} : vector<2x96xf32> to vector<2x32xf32>
    %558 = vector.broadcast %310 : vector<1x32xf32> to vector<2x32xf32>
    %559 = arith.addf %557, %558 : vector<2x32xf32>
    %560 = arith.mulf %547, %559 : vector<2x32xf32>
    %561 = arith.addf %556, %560 : vector<2x32xf32>
    %562 = math.tanh %561 : vector<2x32xf32>
    %cst_162 = arith.constant 1.000000e+00 : f32
    %563 = vector.broadcast %cst_162 : f32 to vector<2x32xf32>
    %564 = arith.subf %563, %555 : vector<2x32xf32>
    %565 = arith.mulf %564, %562 : vector<2x32xf32>
    %566 = arith.mulf %555, %531 : vector<2x32xf32>
    %567 = arith.addf %565, %566 : vector<2x32xf32>
    %568 = arith.index_cast %c6_i32_156 : i32 to index
    %c0_163 = arith.constant 0 : index
    %c0_164 = arith.constant 0 : index
    %569 = vector.load %arg10[%568, %c0_163, %c0_164] : memref<8x2x32xf32, #tpu.memory_space<vmem>>, vector<1x2x32xf32>
    %570 = vector.shape_cast %569 : vector<1x2x32xf32> to vector<2x32xf32>
    %571 = vector.shape_cast %567 : vector<2x32xf32> to vector<1x2x32xf32>
    tpu.vector_store %arg10[%568, %c0_163, %c0_164], %571 {strides = array<i32>} : memref<8x2x32xf32, #tpu.memory_space<vmem>>, vector<1x2x32xf32>,
    %c7_i32_165 = arith.constant 7 : i32
    %572 = arith.index_cast %c7_i32_165 : i32 to index
    %c0_166 = arith.constant 0 : index
    %c0_167 = arith.constant 0 : index
    %573 = vector.load %arg14[%572, %c0_166, %c0_167] : memref<8x2x96xf32, #tpu.memory_space<vmem>>, vector<1x2x96xf32>
    %574 = vector.shape_cast %573 : vector<1x2x96xf32> to vector<2x96xf32>
    %cst_168 = arith.constant dense<0.000000e+00> : vector<2x96xf32>
    %575 = tpu.matmul %567, %308, %cst_168 {dimension_numbers = #tpu.dot_dimension_numbers<[1], [0], [0], [1], [0, 0, 1, 1], [], []>} : vector<2x32xf32>, vector<32x96xf32>, vector<2x96xf32> -> vector<2x96xf32>
    %576 = vector.extract_strided_slice %574 {offsets = [0, 0], sizes = [2, 32], strides = [1, 1]} : vector<2x96xf32> to vector<2x32xf32>
    %577 = vector.extract_strided_slice %575 {offsets = [0, 0], sizes = [2, 32], strides = [1, 1]} : vector<2x96xf32> to vector<2x32xf32>
    %578 = arith.addf %576, %577 : vector<2x32xf32>
    %579 = arith.negf %578 : vector<2x32xf32>
    %580 = math.exp %579 : vector<2x32xf32>
    %cst_169 = arith.constant 1.000000e+00 : f32
    %581 = vector.broadcast %cst_169 : f32 to vector<2x32xf32>
    %582 = arith.addf %581, %580 : vector<2x32xf32>
    %583 = arith.divf %581, %582 : vector<2x32xf32>
    %584 = vector.extract_strided_slice %574 {offsets = [0, 32], sizes = [2, 32], strides = [1, 1]} : vector<2x96xf32> to vector<2x32xf32>
    %585 = vector.extract_strided_slice %575 {offsets = [0, 32], sizes = [2, 32], strides = [1, 1]} : vector<2x96xf32> to vector<2x32xf32>
    %586 = arith.addf %584, %585 : vector<2x32xf32>
    %587 = arith.negf %586 : vector<2x32xf32>
    %588 = math.exp %587 : vector<2x32xf32>
    %cst_170 = arith.constant 1.000000e+00 : f32
    %589 = vector.broadcast %cst_170 : f32 to vector<2x32xf32>
    %590 = arith.addf %589, %588 : vector<2x32xf32>
    %591 = arith.divf %589, %590 : vector<2x32xf32>
    %592 = vector.extract_strided_slice %574 {offsets = [0, 64], sizes = [2, 32], strides = [1, 1]} : vector<2x96xf32> to vector<2x32xf32>
    %593 = vector.extract_strided_slice %575 {offsets = [0, 64], sizes = [2, 32], strides = [1, 1]} : vector<2x96xf32> to vector<2x32xf32>
    %594 = vector.broadcast %310 : vector<1x32xf32> to vector<2x32xf32>
    %595 = arith.addf %593, %594 : vector<2x32xf32>
    %596 = arith.mulf %583, %595 : vector<2x32xf32>
    %597 = arith.addf %592, %596 : vector<2x32xf32>
    %598 = math.tanh %597 : vector<2x32xf32>
    %cst_171 = arith.constant 1.000000e+00 : f32
    %599 = vector.broadcast %cst_171 : f32 to vector<2x32xf32>
    %600 = arith.subf %599, %591 : vector<2x32xf32>
    %601 = arith.mulf %600, %598 : vector<2x32xf32>
    %602 = arith.mulf %591, %567 : vector<2x32xf32>
    %603 = arith.addf %601, %602 : vector<2x32xf32>
    %604 = arith.index_cast %c7_i32_165 : i32 to index
    %c0_172 = arith.constant 0 : index
    %c0_173 = arith.constant 0 : index
    %605 = vector.load %arg10[%604, %c0_172, %c0_173] : memref<8x2x32xf32, #tpu.memory_space<vmem>>, vector<1x2x32xf32>
    %606 = vector.shape_cast %605 : vector<1x2x32xf32> to vector<2x32xf32>
    %607 = vector.shape_cast %603 : vector<2x32xf32> to vector<1x2x32xf32>
    tpu.vector_store %arg10[%604, %c0_172, %c0_173], %607 {strides = array<i32>} : memref<8x2x32xf32, #tpu.memory_space<vmem>>, vector<1x2x32xf32>,
    %c8_i32_174 = arith.constant 8 : i32
    %c1_175 = arith.constant 1 : index
    %c0_176 = arith.constant 0 : index
    %c0_177 = arith.constant 0 : index
    %608 = vector.load %arg12[%c1_175, %c0_176, %c0_177] : memref<2x2x32xf32, #tpu.memory_space<vmem>>, vector<1x2x32xf32>
    %609 = vector.shape_cast %608 : vector<1x2x32xf32> to vector<2x32xf32>
    %610 = vector.shape_cast %603 : vector<2x32xf32> to vector<1x2x32xf32>
    tpu.vector_store %arg12[%c1_175, %c0_176, %c0_177], %610 {strides = array<i32>} : memref<2x2x32xf32, #tpu.memory_space<vmem>>, vector<1x2x32xf32>,
    %c0_i32_178 = arith.constant 0 : i32
    %611 = arith.cmpi eq, %arg0, %c0_i32_178 : i32
    %612 = arith.extui %611 : i1 to i32
    %c0_i32_179 = arith.constant 0 : i32
    %613 = arith.cmpi ne, %612, %c0_i32_179 : i32
    scf.if %613 {
      %c0_180 = arith.constant 0 : index
      %c0_181 = arith.constant 0 : index
      %c0_182 = arith.constant 0 : index
      %614 = vector.load %arg12[%c0_180, %c0_181, %c0_182] : memref<2x2x32xf32, #tpu.memory_space<vmem>>, vector<2x2x32xf32>
      %c0_183 = arith.constant 0 : index
      %c0_184 = arith.constant 0 : index
      %c0_185 = arith.constant 0 : index
      %615 = vector.load %arg11[%c0_183, %c0_184, %c0_185] : memref<2x2x32xf32, #tpu.memory_space<vmem>>, vector<2x2x32xf32>
      tpu.vector_store %arg11[%c0_183, %c0_184, %c0_185], %614 {strides = array<i32>} : memref<2x2x32xf32, #tpu.memory_space<vmem>>, vector<2x2x32xf32>,
    } else {
    }
    return
  }
  func.func @transform_0(%arg0: i32) -> (i32, i32, i32) {
    %c0_i32 = arith.constant 0 : i32
    %c0_i32_0 = arith.constant 0 : i32
    %c0_i32_1 = arith.constant 0 : i32
    return %arg0, %c0_i32, %c0_i32_0 : i32, i32, i32
  }
  func.func @transform_1(%arg0: i32) -> (i32, i32) {
    %c0_i32 = arith.constant 0 : i32
    %c0_i32_0 = arith.constant 0 : i32
    %c0_i32_1 = arith.constant 0 : i32
    return %c0_i32, %c0_i32_0 : i32, i32
  }
  func.func @transform_2(%arg0: i32) -> (i32, i32) {
    %c0_i32 = arith.constant 0 : i32
    %c0_i32_0 = arith.constant 0 : i32
    %c0_i32_1 = arith.constant 0 : i32
    return %c0_i32, %c0_i32_0 : i32, i32
  }
  func.func @transform_3(%arg0: i32) -> (i32, i32) {
    %c0_i32 = arith.constant 0 : i32
    %c0_i32_0 = arith.constant 0 : i32
    %c0_i32_1 = arith.constant 0 : i32
    return %c0_i32, %c0_i32_0 : i32, i32
  }
  func.func @transform_4(%arg0: i32) -> (i32, i32) {
    %c0_i32 = arith.constant 0 : i32
    %c0_i32_0 = arith.constant 0 : i32
    %c0_i32_1 = arith.constant 0 : i32
    return %c0_i32, %c0_i32_0 : i32, i32
  }
  func.func @transform_5(%arg0: i32) -> (i32, i32) {
    %c0_i32 = arith.constant 0 : i32
    %c0_i32_0 = arith.constant 0 : i32
    %c0_i32_1 = arith.constant 0 : i32
    return %c0_i32, %c0_i32_0 : i32, i32
  }
  func.func @transform_6(%arg0: i32) -> (i32, i32) {
    %c0_i32 = arith.constant 0 : i32
    %c0_i32_0 = arith.constant 0 : i32
    %c0_i32_1 = arith.constant 0 : i32
    return %c0_i32, %c0_i32_0 : i32, i32
  }
  func.func @transform_7(%arg0: i32) -> (i32, i32) {
    %c0_i32 = arith.constant 0 : i32
    %c0_i32_0 = arith.constant 0 : i32
    %c0_i32_1 = arith.constant 0 : i32
    return %c0_i32, %c0_i32_0 : i32, i32
  }
  func.func @transform_8(%arg0: i32) -> (i32, i32) {
    %c0_i32 = arith.constant 0 : i32
    %c0_i32_0 = arith.constant 0 : i32
    %c0_i32_1 = arith.constant 0 : i32
    return %c0_i32, %c0_i32_0 : i32, i32
  }
  func.func @transform_9(%arg0: i32) -> (i32, i32, i32) {
    %c0_i32 = arith.constant 0 : i32
    %c0_i32_0 = arith.constant 0 : i32
    %c0_i32_1 = arith.constant 0 : i32
    return %arg0, %c0_i32, %c0_i32_0 : i32, i32, i32
  }
  func.func @transform_10(%arg0: i32) -> (i32, i32, i32) {
    %c0_i32 = arith.constant 0 : i32
    %c0_i32_0 = arith.constant 0 : i32
    %c0_i32_1 = arith.constant 0 : i32
    %c0_i32_2 = arith.constant 0 : i32
    return %c0_i32, %c0_i32_0, %c0_i32_1 : i32, i32, i32
  }
}

</mosaic_0001>

<bundles_post_ra>
// kernel: tpu_custom_call.1
= control target key start
LH: loop header
LB: loop body
LE: loop exit
PB: predicated region body
PF: predicated region fallthrough
CT: control target
= control target key end

     0   :  { %16 = vsyncpa [#allocation6], 0  ;;  %s2164_s0 = inlined_call_operand.hbm [shape: f32[8,2,16], index: 0, kind: input, shape index: {}]   ;;  %s2165_s1 = inlined_call_operand.hbm [shape: f32[16,96], index: 1, kind: input, shape index: {}]   ;;  %s2166_s2 = inlined_call_operand.hbm [shape: f32[32,96], index: 2, kind: input, shape index: {}]   ;;  %s2167_s3 = inlined_call_operand.vmem [shape: f32[1,96], index: 3, kind: input, shape index: {}]   ;;  %s2168_s4 = inlined_call_operand.vmem [shape: f32[1,32], index: 4, kind: input, shape index: {}]   ;;  %s2169_s5 = inlined_call_operand.hbm [shape: f32[32,96], index: 5, kind: input, shape index: {}]   ;;  %s2170_s6 = inlined_call_operand.hbm [shape: f32[32,96], index: 6, kind: input, shape index: {}]   ;;  %s2171_s7 = inlined_call_operand.vmem [shape: f32[1,96], index: 7, kind: input, shape index: {}]   ;;  %s2172_s8 = inlined_call_operand.vmem [shape: f32[1,32], index: 8, kind: input, shape index: {}]   ;;  %s2173_s9 = inlined_call_operand.hbm [shape: f32[8,2,32], index: 9, kind: output, shape index: {0}]   ;;  %s2174_s10 = inlined_call_operand.hbm [shape: f32[2,2,32], index: 10, kind: output, shape index: {1}]  }
   0x1   :  { %17 = vsyncpa [#allocation9], 0 }
   0x2   :  { %18 = vsyncpa [#allocation12], 0 }
   0x3   :  { %19 = vsyncpa [#allocation7], 0  ;;  %s38_s15 = sshll.u32 %s2165_s1, 4  ;;  %s39_s15 = int_to_ptr.hbm [resolvable:$true] %s38_s15 }
   0x4   :  { %20 = vsyncpa [#allocation16], 0  ;;  %s1819_s16 = smov [#allocation8]   ;;  %s68_s20 = sshll.u32 %s2169_s5, 4  ;;  %s69_s20 = int_to_ptr.hbm [resolvable:$true] %s68_s20 }
   0x5   :  { %s40_s17 = sshll.u32 %s1819_s16, 4  ;;  %s1820_s21 = smov 128   ;;  %s41_s17 = int_to_ptr.vmem [resolvable:$true] %s40_s17 }
   0x6   :  { %s1821_s22 = smov 8   ;;  %s1822_s23 = smov [#allocation11]  }
   0x7   :  { %46 = dma.hbm_to_vmem [thread:$0]  %s39_s15, 256, %s41_s17, [#allocation9], %s1820_s21, %s1820_s21, %s1821_s22  }
   0x8   :  { %s70_s24 = sshll.u32 %s1822_s23, 4  ;;  %s25_s26 = sshll.u32 %s2164_s0, 4  ;;  %s71_s24 = int_to_ptr.vmem [resolvable:$true] %s70_s24  ;;  %s26_s26 = int_to_ptr.hbm [resolvable:$true] %s25_s26 }
   0x9   :  { %76 = dma.hbm_to_vmem [thread:$0]  %s69_s20, 512, %s71_s24, [#allocation12], %s1820_s21, %s1820_s21, %s1821_s22  }
   0xa   :  { %s1823_s5 = smov [#allocation5]   ;;  %s51_s30 = sshll.u32 %s2166_s2, 4  ;;  %s52_s30 = int_to_ptr.hbm [resolvable:$true] %s51_s30 }
   0xb   :  { %s27_s27 = sshll.u32 %s1823_s5, 4  ;;  %s1824_s11 = smov 32   ;;  %s28_s27 = int_to_ptr.vmem [resolvable:$true] %s27_s27 }
   0xc   :  { %s1825_s12 = smov 2   ;;  %s1826_s0 = smov [#allocation10]  }
   0xd   :  { %33 = dma.hbm_to_vmem [thread:$0]  %s26_s26, 256, %s28_s27, [#allocation6], %s1824_s11, %s1824_s11, %s1825_s12  }
   0xe   :  { %s53_s13 = sshll.u32 %s1826_s0, 4  ;;  %s81_s16 = sshll.u32 %s2170_s6, 4  ;;  %s54_s13 = int_to_ptr.vmem [resolvable:$true] %s53_s13  ;;  %s82_s16 = int_to_ptr.hbm [resolvable:$true] %s81_s16 }
   0xf   :  { %59 = dma.hbm_to_vmem [thread:$0]  %s52_s30, 512, %s54_s13, [#allocation9], %s1820_s21, %s1820_s21, %s1821_s22  }
  0x10   :  { %s1827_s2 = smov [#allocation13]  }
  0x11   :  { %s83_s17 = sshll.u32 %s1827_s2, 4  ;;  %s84_s17 = int_to_ptr.vmem [resolvable:$true] %s83_s17 }
  0x12   :  { %89 = dma.hbm_to_vmem [thread:$0]  %s82_s16, 512, %s84_s17, [#allocation12], %s1820_s21, %s1820_s21, %s1821_s22  }
  0x13   :  { %1809 = dma.done.wait [#allocation6], 256  }
  0x14   :  { %1810 = vsyncadd [#allocation6], 4294967040 }
  0x15   :  { %1811 = dma.done.wait [#allocation9], 768  }
  0x16   :  { %1812 = vsyncadd [#allocation9], 4294966528 }
  0x17   :  { %1813 = dma.done.wait [#allocation12], 1024  }
  0x18   :  { %1814 = vsyncadd [#allocation12], 4294966272  ;;  %vm118_vm0 = vcmask 254976   ;;  %v1828_v0 = vmov 0.0   ;;  %v126_v1 = vld [vmem:[#allocation10 + $0x18] sm:$0xff]  ;;  %v125_v2 = vld [vmem:[#allocation10 + $0x10] sm:$0xff] }
  0x19   :  { %119 = vst.msk [vmem:[#allocation2] sm:$0x3] %vm118_vm0, %v1828_v0  ;;  %234 = vmatpush.msra.mxu1 %v126_v1  ;;  %v124_v3 = vld [vmem:[#allocation10 + $0x8] sm:$0xff]  ;;  %v122_v4 = vld [vmem:[#allocation8 + $0x8] sm:$0xff]  ;;  %v121_v5 = vld [vmem:[#allocation8] sm:$0xff]  ;;  %vm218_vm1 = vcmask 261120   ;;  %312 = vmatpush.msra.mxu2 %v126_v1 }
  0x1a   :  { %120 = vst.msk [vmem:[#allocation2 + $0x2] sm:$0x3] %vm118_vm0, %v1828_v0  ;;  %184 = vmatpush.msra.mxu0 %v122_v4  ;;  %v123_v6 = vld [vmem:[#allocation10] sm:$0xff]  ;;  %382 = vmatpush.msra.mxu3 %v126_v1  ;;  %v1541_v12 = vld [vmem:[%s2168_s4] ss:$0 sm:$0xff]  ;;  %s1829_s19 = smov 64  }
  0x1b   :  { %v129_v8 = vld [vmem:[#allocation5] sm:$0x3]  ;;  %v130_v9 = vld [vmem:[#allocation5 + $0x2] sm:$0x3]  ;;  %235 = vmatpush.msra.mxu1 %v125_v2  ;;  %v131_v10 = vld [vmem:[#allocation5 + $0x4] sm:$0x3]  ;;  %313 = vmatpush.msra.mxu2 %v125_v2 }
  0x1c   :  { %v132_v11 = vld [vmem:[#allocation5 + $0x6] sm:$0x3]  ;;  %148 = vst [vmem:[#allocation1] ss:$4 sm:$0xff] %v129_v8  ;;  %185 = vmatpush.msra.mxu0 %v121_v5  ;;  %383 = vmatpush.msra.mxu3 %v125_v2  ;;  %vm165_vm2 = vcmask 130048   ;;  %vm207_vm3 = vcmask 779264  }
  0x1d   :  { %150 = vst [vmem:[#allocation1 + $0x1] ss:$4 sm:$0xff] %v130_v9  ;;  %236 = vmatpush.msra.mxu1 %v124_v3  ;;  %264 = vrot.lane.b32.xlu0 %v1541_v12, %s1829_s19  ;;  %v1933_v17 = vld [vmem:[%s2167_s3] ss:$0 sm:$0xff]  ;;  %s1830_s3 = smov 96   ;;  %s1458_s26 = sshll.u32 %s2173_s9, 4  ;;  %s1459_s26 = int_to_ptr.hbm [resolvable:$true] %s1458_s26 }
  0x1e   :  { %152 = vst [vmem:[#allocation1 + $0x2] ss:$4 sm:$0xff] %v131_v10  ;;  %314 = vmatpush.msra.mxu2 %v124_v3  ;;  %384 = vmatpush.msra.mxu3 %v124_v3  ;;  %s1832_s5 = smov [#allocation15]   ;;  %s1471_s30 = sshll.u32 %s2174_s10, 4  ;;  %s1472_s30 = int_to_ptr.hbm [resolvable:$true] %s1471_s30 }
  0x1f   :  { %154 = vst [vmem:[#allocation1 + $0x3] ss:$4 sm:$0xff] %v132_v11  ;;  %237 = vmatpush.msra.mxu1 %v123_v6  ;;  %662 = vmatpush.msrb.mxu0 %v126_v1  ;;  %s1469_s27 = sshll.u32 %s1832_s5, 4  ;;  %s1470_s27 = int_to_ptr.vmem [resolvable:$true] %s1469_s27 }
  0x20   :  { %v216_v7 = vld [vmem:[#allocation2] sm:$0x3]  ;;  %315 = vmatpush.msra.mxu2 %v123_v6  ;;  %385 = vmatpush.msra.mxu3 %v123_v6 }
  0x21   :  { %285 = vrot.lane.b32.xlu2 %v216_v7, %s1824_s11  ;;  %1493 = vmatmul.msk.f32.vlgmr.msra.gmra.mxu1 %vm218_vm1, %v216_v7 }
  0x22   :  { %452 = vmatpush.msrb.mxu1 %v126_v1  ;;  %522 = vmatpush.msrb.mxu2 %v126_v1 }
  0x23   :  { %592 = vmatpush.msrb.mxu3 %v126_v1  ;;  %663 = vmatpush.msrb.mxu0 %v125_v2 }
  0x24   :  { %453 = vmatpush.msrb.mxu1 %v125_v2  ;;  %523 = vmatpush.msrb.mxu2 %v125_v2 }
  0x25   :  { %593 = vmatpush.msrb.mxu3 %v125_v2  ;;  %664 = vmatpush.msrb.mxu0 %v124_v3 }
  0x26   :  { %v163_v13 = vld.sshfl [vmem:[#allocation1] sm:$0xff pattern:$0x73625140]  ;;  %454 = vmatpush.msrb.mxu1 %v124_v3  ;;  %524 = vmatpush.msrb.mxu2 %v124_v3 }
  0x27   :  { %1491 = vmatmul.msk.f32.vlgmr.msra.gmra.mxu0 %vm165_vm2, %v163_v13  ;;  %594 = vmatpush.msrb.mxu3 %v124_v3 }
  0x28   :  { %455 = vmatpush.msrb.mxu1 %v123_v6  ;;  %525 = vmatpush.msrb.mxu2 %v123_v6 }
  0x29   :  { %595 = vmatpush.msrb.mxu3 %v123_v6  ;;  %665 = vmatpush.msrb.mxu0 %v123_v6 }
  0x2a   :  { %732 = vmatpush.msra.mxu1 %v126_v1 }
  0x2c   :  { %733 = vmatpush.msra.mxu1 %v125_v2 }
  0x2e   :  { %734 = vmatpush.msra.mxu1 %v124_v3 }
  0x30   :  { %735 = vmatpush.msra.mxu1 %v123_v6 }
  0x7b   :  { %v286_v43 = vpop.permute.xlu2 %285 }
  0x8f   :  { %v1927_v14 = vpop.permute.xlu0 %264 }
  0x9e   :  { %v239_v15 = vpop.f32.mrf.mxu1 }
  0x9f   :  { %v267_v16 = vadd.f32 %v1927_v14, %v239_v15 }
  0xa1   :  { %269 = vrot.lane.b32.xlu0 %v267_v16, %s1829_s19 }
  0xa4   :  { %v187_v18 = vpop.f32.mrf.mxu0 }
  0xa5   :  { %v188_v19 = vadd.f32 %v1933_v17, %v187_v18 }
  0xa7   :  { %v195_v20 = vrot.slane %v188_v19, 2  ;;  %v196_v21 = vrot.slane %v188_v19, 4  ;;  %v197_v22 = vrot.slane %v188_v19, 6  ;;  %208 = vst.msk [vmem:[#allocation4] sm:$0x3] %vm207_vm3, %v188_v19 }
  0xa9   :  { %209 = vst.msk [vmem:[#allocation4 + $0x2] sm:$0x3] %vm207_vm3, %v195_v20 }
  0xaa   :  { %210 = vst.msk [vmem:[#allocation4 + $0x4] sm:$0x3] %vm207_vm3, %v196_v21 }
  0xab   :  { %211 = vst.msk [vmem:[#allocation4 + $0x6] sm:$0x3] %vm207_vm3, %v197_v22 }
  0xae   :  { %v217_v23 = vld [vmem:[#allocation4] sm:$0x3] }
  0xaf   :  { %v242_v24 = vadd.f32 %v239_v15, %v217_v23 }
  0xb0   :  { %v297_v53 = vld [vmem:[#allocation4 + $0x2] sm:$0x3] }
  0xb1   :  { %v1494_v25 = vmul.f32 -1.442695, %v242_v24  ;;  %v367_v20 = vld [vmem:[#allocation4 + $0x4] sm:$0x3] }
  0xb3   :  { %1545 = vpow2.f32 %v1494_v25 }
  0xb9   :  { %v1546_v26 = vpop.eup %1545 }
  0xba   :  { %v246_v27 = vadd.f32 1.0, %v1546_v26 }
  0xbc   :  { %1547 = vrcp.f32 %v246_v27  ;;  %v258_v33 = vand.u32 2147483648, %v246_v27  ;;  %vm252_vm5 = vweird.f32 %v246_v27  ;;  %v256_v34 = vand.u32 2147483647, %v246_v27 }
  0xbe   :  { %v259_v36 = vor.u32 1.1754944e-38, %v258_v33  ;;  %vm257_vm7 = vcmp.eq.f32.partialorder %v256_v34, 8.507059e+37 }
  0xc2   :  { %v1548_v28 = vpop.eup %1547 }
  0xc3   :  { %v248_v29 = vmul.f32 %v1548_v28, %v246_v27  ;;  %vm253_vm4 = vweird.f32 %v1548_v28 }
  0xc4   :  { %vm254_vm6 = vmor %vm252_vm5, %vm253_vm4 }
  0xc5   :  { %v249_v30 = vsub.f32 1.0, %v248_v29 }
  0xc7   :  { %v250_v31 = vmul.f32 %v1548_v28, %v249_v30 }
  0xc9   :  { %v251_v32 = vadd.f32 %v1548_v28, %v250_v31 }
  0xcb   :  { %v255_v35 = vsel %vm254_vm6, %v1548_v28, %v251_v32 }
  0xcc   :  { %v260_v37 = vsel %vm257_vm7, %v259_v36, %v255_v35 }
  0xcd   :  { %v279_v44 = vsub.f32 1.0, %v260_v37  ;;  %v288_v46 = vmul.f32 %v286_v43, %v260_v37 }
 0x113   :  { %v270_v38 = vpop.permute.xlu0 %269 }
 0x114   :  { %v272_v39 = vmul.f32 %v270_v38, %v260_v37 }
 0x116   :  { %274 = vrot.lane.b32.xlu1 %v272_v39, %s1829_s19 }
 0x188   :  { %v275_v40 = vpop.permute.xlu1 %274 }
 0x189   :  { %v277_v41 = vadd.f32 %v275_v40, %v217_v23 }
 0x18b   :  { %1549 = vtanh.f32 %v277_v41 }
 0x191   :  { %v1550_v42 = vpop.eup %1549 }
 0x192   :  { %281 = vrot.lane.b32.xlu1 %v1550_v42, %s1830_s3 }
 0x204   :  { %v282_v45 = vpop.permute.xlu1 %281 }
 0x205   :  { %v284_v47 = vmul.f32 %v282_v45, %v279_v44 }
 0x207   :  { %v289_v48 = vadd.f32 %v288_v46, %v284_v47 }
 0x209   :  { %291 = vrot.lane.b32.xlu2 %v289_v48, %s1830_s3 }
 0x263   :  { %v292_v49 = vpop.permute.xlu2 %291 }
 0x264   :  { %295 = vst.msk [vmem:[#allocation3] sm:$0x3] %vm118_vm0, %v292_v49  ;;  %1495 = vmatmul.msk.f32.vlgmr.msra.gmra.mxu2 %vm218_vm1, %v292_v49  ;;  %v437_v49 = vld [vmem:[#allocation4 + $0x6] sm:$0x3] }
 0x26b   :  { %v797_v50 = vld [vmem:[#allocation3] sm:$0x3] }
 0x26c   :  { %816 = vst [vmem:[#allocation1] ss:$4 sm:$0xff] %v797_v50 }
 0x2e7   :  { %v317_v51 = vpop.f32.mrf.mxu2 }
 0x2e8   :  { %v340_v52 = vadd.f32 %v317_v51, %v1927_v14  ;;  %v320_v54 = vadd.f32 %v317_v51, %v297_v53 }
 0x2ea   :  { %342 = vrot.lane.b32.xlu0 %v340_v52, %s1829_s19  ;;  %v1496_v55 = vmul.f32 -1.442695, %v320_v54 }
 0x2ec   :  { %1551 = vpow2.f32 %v1496_v55 }
 0x2f2   :  { %v1552_v56 = vpop.eup %1551 }
 0x2f3   :  { %v324_v57 = vadd.f32 1.0, %v1552_v56 }
 0x2f5   :  { %1553 = vrcp.f32 %v324_v57  ;;  %v336_v63 = vand.u32 2147483648, %v324_v57  ;;  %vm330_vm9 = vweird.f32 %v324_v57  ;;  %v334_v0 = vand.u32 2147483647, %v324_v57 }
 0x2f7   :  { %v337_v2 = vor.u32 1.1754944e-38, %v336_v63  ;;  %vm335_vm11 = vcmp.eq.f32.partialorder %v334_v0, 8.507059e+37 }
 0x2fb   :  { %v1554_v58 = vpop.eup %1553 }
 0x2fc   :  { %v326_v59 = vmul.f32 %v1554_v58, %v324_v57  ;;  %vm331_vm8 = vweird.f32 %v1554_v58 }
 0x2fd   :  { %vm332_vm10 = vmor %vm330_vm9, %vm331_vm8 }
 0x2fe   :  { %v327_v60 = vsub.f32 1.0, %v326_v59 }
 0x300   :  { %v328_v61 = vmul.f32 %v1554_v58, %v327_v60 }
 0x302   :  { %v329_v62 = vadd.f32 %v1554_v58, %v328_v61 }
 0x304   :  { %v333_v1 = vsel %vm332_vm10, %v1554_v58, %v329_v62 }
 0x305   :  { %v338_v4 = vsel %vm335_vm11, %v337_v2, %v333_v1 }
 0x306   :  { %v352_v9 = vsub.f32 1.0, %v338_v4  ;;  %v358_v11 = vmul.f32 %v338_v4, %v289_v48 }
 0x35c   :  { %v343_v3 = vpop.permute.xlu0 %342 }
 0x35d   :  { %v345_v5 = vmul.f32 %v343_v3, %v338_v4 }
 0x35f   :  { %347 = vrot.lane.b32.xlu1 %v345_v5, %s1829_s19  ;;  %v133_v5 = vld [vmem:[#allocation5 + $0x8] sm:$0x3] }
 0x360   :  { %156 = vst [vmem:[#allocation1 + $0x20] ss:$4 sm:$0xff] %v133_v5 }
 0x3d1   :  { %v348_v6 = vpop.permute.xlu1 %347 }
 0x3d2   :  { %v350_v7 = vadd.f32 %v348_v6, %v297_v53  ;;  %v134_v6 = vld [vmem:[#allocation5 + $0xa] sm:$0x3] }
 0x3d3   :  { %158 = vst [vmem:[#allocation1 + $0x21] ss:$4 sm:$0xff] %v134_v6 }
 0x3d4   :  { %1555 = vtanh.f32 %v350_v7  ;;  %v135_v7 = vld [vmem:[#allocation5 + $0xc] sm:$0x3] }
 0x3d5   :  { %160 = vst [vmem:[#allocation1 + $0x22] ss:$4 sm:$0xff] %v135_v7 }
 0x3da   :  { %v1556_v8 = vpop.eup %1555 }
 0x3db   :  { %354 = vrot.lane.b32.xlu2 %v1556_v8, %s1830_s3  ;;  %v136_v8 = vld [vmem:[#allocation5 + $0xe] sm:$0x3] }
 0x3dc   :  { %162 = vst [vmem:[#allocation1 + $0x23] ss:$4 sm:$0xff] %v136_v8 }
 0x435   :  { %v355_v10 = vpop.permute.xlu2 %354 }
 0x436   :  { %v357_v12 = vmul.f32 %v355_v10, %v352_v9  ;;  %v164_v9 = vld.sshfl [vmem:[#allocation1 + $0x20] sm:$0xff pattern:$0x73625140] }
 0x437   :  { %1492 = vmatmul.msk.f32.gmra.mxu0 %vm165_vm2, %v164_v9 }
 0x438   :  { %v359_v13 = vadd.f32 %v358_v11, %v357_v12 }
 0x43a   :  { %361 = vrot.lane.b32.xlu0 %v359_v13, %s1830_s3 }
 0x4ac   :  { %v362_v15 = vpop.permute.xlu0 %361 }
 0x4ad   :  { %365 = vst.msk [vmem:[#allocation3 + $0x2] sm:$0x3] %vm118_vm0, %v362_v15  ;;  %1497 = vmatmul.msk.f32.vlgmr.msra.gmra.mxu3 %vm218_vm1, %v362_v15 }
 0x4b4   :  { %v798_v16 = vld [vmem:[#allocation3 + $0x2] sm:$0x3] }
 0x4b5   :  { %818 = vst [vmem:[#allocation1 + $0x1] ss:$4 sm:$0xff] %v798_v16  ;;  %v790_v16 = vld [vmem:[#allocation11 + $0x18] sm:$0xff] }
 0x4b6   :  { %849 = vmatpush.msra.mxu2 %v790_v16 }
 0x530   :  { %v387_v18 = vpop.f32.mrf.mxu3 }
 0x531   :  { %v410_v19 = vadd.f32 %v387_v18, %v1927_v14  ;;  %v390_v21 = vadd.f32 %v387_v18, %v367_v20  ;;  %v789_v18 = vld [vmem:[#allocation11 + $0x10] sm:$0xff] }
 0x532   :  { %850 = vmatpush.msra.mxu2 %v789_v18 }
 0x533   :  { %412 = vrot.lane.b32.xlu1 %v410_v19, %s1829_s19  ;;  %v1498_v22 = vmul.f32 -1.442695, %v390_v21  ;;  %v788_v19 = vld [vmem:[#allocation11 + $0x8] sm:$0xff] }
 0x534   :  { %851 = vmatpush.msra.mxu2 %v788_v19 }
 0x535   :  { %1557 = vpow2.f32 %v1498_v22 }
 0x53b   :  { %v1558_v23 = vpop.eup %1557 }
 0x53c   :  { %v394_v24 = vadd.f32 1.0, %v1558_v23  ;;  %v190_v23 = vpop.f32.mrf.mxu0 }
 0x53e   :  { %1559 = vrcp.f32 %v394_v24  ;;  %v406_v30 = vand.u32 2147483648, %v394_v24  ;;  %vm400_vm13 = vweird.f32 %v394_v24  ;;  %v404_v31 = vand.u32 2147483647, %v394_v24 }
 0x540   :  { %v407_v33 = vor.u32 1.1754944e-38, %v406_v30  ;;  %vm405_vm15 = vcmp.eq.f32.partialorder %v404_v31, 8.507059e+37 }
 0x544   :  { %v1560_v25 = vpop.eup %1559 }
 0x545   :  { %v396_v26 = vmul.f32 %v1560_v25, %v394_v24  ;;  %vm401_vm12 = vweird.f32 %v1560_v25 }
 0x546   :  { %vm402_vm14 = vmor %vm400_vm13, %vm401_vm12 }
 0x547   :  { %v397_v27 = vsub.f32 1.0, %v396_v26 }
 0x549   :  { %v398_v28 = vmul.f32 %v1560_v25, %v397_v27 }
 0x54b   :  { %v399_v29 = vadd.f32 %v1560_v25, %v398_v28 }
 0x54d   :  { %v403_v32 = vsel %vm402_vm14, %v1560_v25, %v399_v29  ;;  %v191_v25 = vadd.f32 %v1933_v17, %v190_v23  ;;  %v1982_v17 = vld [vmem:[%s2171_s7] ss:$0 sm:$0xff] }
 0x54e   :  { %v408_v35 = vsel %vm405_vm15, %v407_v33, %v403_v32 }
 0x54f   :  { %v422_v40 = vsub.f32 1.0, %v408_v35  ;;  %v428_v42 = vmul.f32 %v408_v35, %v359_v13  ;;  %v198_v26 = vrot.slane %v191_v25, 2  ;;  %v199_v27 = vrot.slane %v191_v25, 4  ;;  %212 = vst.msk [vmem:[#allocation4 + $0x8] sm:$0x3] %vm207_vm3, %v191_v25 }
 0x550   :  { %v200_v28 = vrot.slane %v191_v25, 6 }
 0x551   :  { %213 = vst.msk [vmem:[#allocation4 + $0xa] sm:$0x3] %vm207_vm3, %v198_v26 }
 0x552   :  { %214 = vst.msk [vmem:[#allocation4 + $0xc] sm:$0x3] %vm207_vm3, %v199_v27 }
 0x553   :  { %215 = vst.msk [vmem:[#allocation4 + $0xe] sm:$0x3] %vm207_vm3, %v200_v28 }
 0x5a5   :  { %v413_v34 = vpop.permute.xlu1 %412 }
 0x5a6   :  { %v415_v36 = vmul.f32 %v413_v34, %v408_v35 }
 0x5a8   :  { %417 = vrot.lane.b32.xlu2 %v415_v36, %s1829_s19  ;;  %v507_v36 = vld [vmem:[#allocation4 + $0x8] sm:$0x3] }
 0x602   :  { %v418_v37 = vpop.permute.xlu2 %417 }
 0x603   :  { %v420_v38 = vadd.f32 %v418_v37, %v367_v20  ;;  %v787_v20 = vld [vmem:[#allocation11] sm:$0xff] }
 0x604   :  { %852 = vmatpush.msra.mxu2 %v787_v20 }
 0x605   :  { %1561 = vtanh.f32 %v420_v38 }
 0x60b   :  { %v1562_v39 = vpop.eup %1561 }
 0x60c   :  { %424 = vrot.lane.b32.xlu0 %v1562_v39, %s1830_s3 }
 0x67e   :  { %v425_v41 = vpop.permute.xlu0 %424 }
 0x67f   :  { %v427_v43 = vmul.f32 %v425_v41, %v422_v40 }
 0x681   :  { %v429_v44 = vadd.f32 %v428_v42, %v427_v43 }
 0x683   :  { %431 = vrot.lane.b32.xlu1 %v429_v44, %s1830_s3 }
 0x6f5   :  { %v432_v45 = vpop.permute.xlu1 %431 }
 0x6f6   :  { %435 = vst.msk [vmem:[#allocation3 + $0x4] sm:$0x3] %vm118_vm0, %v432_v45  ;;  %1499 = vmatmul.msk.f32.vlgmr.msrb.gmra.mxu1 %vm218_vm1, %v432_v45 }
 0x6fd   :  { %v799_v46 = vld [vmem:[#allocation3 + $0x4] sm:$0x3] }
 0x6fe   :  { %820 = vst [vmem:[#allocation1 + $0x2] ss:$4 sm:$0xff] %v799_v46 }
 0x773   :  { %v457_v47 = vpop.f32.mrf.mxu1 }
 0x774   :  { %v480_v48 = vadd.f32 %v457_v47, %v1927_v14  ;;  %v460_v50 = vadd.f32 %v457_v47, %v437_v49 }
 0x776   :  { %482 = vrot.lane.b32.xlu2 %v480_v48, %s1829_s19  ;;  %v1500_v51 = vmul.f32 -1.442695, %v460_v50 }
 0x778   :  { %1563 = vpow2.f32 %v1500_v51 }
 0x77e   :  { %v1564_v52 = vpop.eup %1563 }
 0x77f   :  { %v464_v53 = vadd.f32 1.0, %v1564_v52 }
 0x781   :  { %1565 = vrcp.f32 %v464_v53  ;;  %v476_v59 = vand.u32 2147483648, %v464_v53  ;;  %vm470_vm5 = vweird.f32 %v464_v53  ;;  %v474_v60 = vand.u32 2147483647, %v464_v53 }
 0x783   :  { %v477_v62 = vor.u32 1.1754944e-38, %v476_v59  ;;  %vm475_vm7 = vcmp.eq.f32.partialorder %v474_v60, 8.507059e+37 }
 0x787   :  { %v1566_v54 = vpop.eup %1565 }
 0x788   :  { %v466_v55 = vmul.f32 %v1566_v54, %v464_v53  ;;  %vm471_vm4 = vweird.f32 %v1566_v54 }
 0x789   :  { %vm472_vm6 = vmor %vm470_vm5, %vm471_vm4 }
 0x78a   :  { %v467_v56 = vsub.f32 1.0, %v466_v55 }
 0x78c   :  { %v468_v57 = vmul.f32 %v1566_v54, %v467_v56 }
 0x78e   :  { %v469_v58 = vadd.f32 %v1566_v54, %v468_v57 }
 0x790   :  { %v473_v61 = vsel %vm472_vm6, %v1566_v54, %v469_v58 }
 0x791   :  { %v478_v0 = vsel %vm475_vm7, %v477_v62, %v473_v61  ;;  %v1996_v61 = vld [vmem:[#allocation13 + $0x18] sm:$0xff]  ;;  %v2000_v62 = vld [vmem:[#allocation13 + $0x10] sm:$0xff] }
 0x792   :  { %v492_v10 = vsub.f32 1.0, %v478_v0  ;;  %v498_v12 = vmul.f32 %v478_v0, %v429_v44  ;;  %900 = vmatpush.msra.mxu3 %v1996_v61  ;;  %976 = vmatpush.msra.mxu0 %v1996_v61 }
 0x793   :  { %1045 = vmatpush.msrb.mxu1 %v1996_v61 }
 0x794   :  { %901 = vmatpush.msra.mxu3 %v2000_v62  ;;  %977 = vmatpush.msra.mxu0 %v2000_v62 }
 0x795   :  { %1046 = vmatpush.msrb.mxu1 %v2000_v62 }
 0x7d0   :  { %v483_v63 = vpop.permute.xlu2 %482 }
 0x7d1   :  { %v485_v1 = vmul.f32 %v483_v63, %v478_v0  ;;  %v2005_v63 = vld [vmem:[#allocation13 + $0x8] sm:$0xff]  ;;  %v2008_v0 = vld [vmem:[#allocation13] sm:$0xff] }
 0x7d2   :  { %902 = vmatpush.msra.mxu3 %v2005_v63  ;;  %978 = vmatpush.msra.mxu0 %v2005_v63 }
 0x7d3   :  { %487 = vrot.lane.b32.xlu0 %v485_v1, %s1829_s19  ;;  %v1544_v1 = vld [vmem:[%s2172_s8] ss:$0 sm:$0xff]  ;;  %1047 = vmatpush.msrb.mxu1 %v2005_v63  ;;  %s1831_s8 = smov [#allocation14]  }
 0x7d4   :  { %903 = vmatpush.msra.mxu3 %v2008_v0  ;;  %979 = vmatpush.msra.mxu0 %v2008_v0  ;;  %s1456_s24 = sshll.u32 %s1831_s8, 4  ;;  %s1457_s24 = int_to_ptr.vmem [resolvable:$true] %s1456_s24 }
 0x7d5   :  { %1048 = vmatpush.msrb.mxu1 %v2008_v0 }
 0x845   :  { %v488_v2 = vpop.permute.xlu0 %487 }
 0x846   :  { %v490_v3 = vadd.f32 %v488_v2, %v437_v49 }
 0x848   :  { %1567 = vtanh.f32 %v490_v3  ;;  %v2028_v3 = vld [vmem:[#allocation2 + $0x2] sm:$0x3] }
 0x84e   :  { %v1568_v4 = vpop.eup %1567 }
 0x84f   :  { %494 = vrot.lane.b32.xlu1 %v1568_v4, %s1830_s3 }
 0x8c1   :  { %v495_v11 = vpop.permute.xlu1 %494 }
 0x8c2   :  { %v497_v13 = vmul.f32 %v495_v11, %v492_v10  ;;  %v577_v10 = vld [vmem:[#allocation4 + $0xa] sm:$0x3] }
 0x8c4   :  { %v1965_v15 = vadd.f32 %v498_v12, %v497_v13 }
 0x8c6   :  { %501 = vrot.lane.b32.xlu2 %v1965_v15, %s1830_s3 }
 0x920   :  { %v502_v21 = vpop.permute.xlu2 %501 }
 0x921   :  { %505 = vst.msk [vmem:[#allocation3 + $0x6] sm:$0x3] %vm118_vm0, %v502_v21  ;;  %1501 = vmatmul.msk.f32.vlgmr.msrb.gmra.mxu2 %vm218_vm1, %v502_v21 }
 0x922   :  { %1321 = vmatpush.msrb.mxu2 %v1996_v61 }
 0x924   :  { %1322 = vmatpush.msrb.mxu2 %v2000_v62 }
 0x926   :  { %1323 = vmatpush.msrb.mxu2 %v2005_v63 }
 0x928   :  { %v800_v22 = vld [vmem:[#allocation3 + $0x6] sm:$0x3]  ;;  %1324 = vmatpush.msrb.mxu2 %v2008_v0 }
 0x929   :  { %822 = vst [vmem:[#allocation1 + $0x3] ss:$4 sm:$0xff] %v800_v22 }
 0x930   :  { %v831_v24 = vld.sshfl [vmem:[#allocation1] sm:$0xff pattern:$0x73625140] }
 0x931   :  { %1509 = vmatmul.msk.f32.vlgmr.msra.gmra.mxu2 %vm218_vm1, %v831_v24 }
 0x9a4   :  { %v527_v29 = vpop.f32.mrf.mxu2 }
 0x9a5   :  { %v550_v30 = vadd.f32 %v527_v29, %v1927_v14  ;;  %v530_v37 = vadd.f32 %v527_v29, %v507_v36 }
 0x9a7   :  { %552 = vrot.lane.b32.xlu0 %v550_v30, %s1829_s19  ;;  %v1502_v38 = vmul.f32 -1.442695, %v530_v37 }
 0x9a9   :  { %1569 = vpow2.f32 %v1502_v38 }
 0x9af   :  { %v1570_v39 = vpop.eup %1569 }
 0x9b0   :  { %v534_v40 = vadd.f32 1.0, %v1570_v39 }
 0x9b2   :  { %1571 = vrcp.f32 %v534_v40  ;;  %v546_v46 = vand.u32 2147483648, %v534_v40  ;;  %vm540_vm8 = vweird.f32 %v534_v40  ;;  %v544_v47 = vand.u32 2147483647, %v534_v40 }
 0x9b4   :  { %v854_v31 = vpop.f32.mrf.mxu2  ;;  %v547_v49 = vor.u32 1.1754944e-38, %v546_v46  ;;  %vm545_vm10 = vcmp.eq.f32.partialorder %v544_v47, 8.507059e+37 }
 0x9b5   :  { %v855_v32 = vadd.f32 %v1982_v17, %v854_v31 }
 0x9b7   :  { %v862_v33 = vrot.slane %v855_v32, 2  ;;  %v863_v34 = vrot.slane %v855_v32, 4  ;;  %v864_v35 = vrot.slane %v855_v32, 6  ;;  %874 = vst.msk [vmem:[#allocation4] sm:$0x3] %vm207_vm3, %v855_v32 }
 0x9b8   :  { %v1572_v41 = vpop.eup %1571 }
 0x9b9   :  { %875 = vst.msk [vmem:[#allocation4 + $0x2] sm:$0x3] %vm207_vm3, %v862_v33  ;;  %v536_v42 = vmul.f32 %v1572_v41, %v534_v40  ;;  %vm541_vm2 = vweird.f32 %v1572_v41 }
 0x9ba   :  { %876 = vst.msk [vmem:[#allocation4 + $0x4] sm:$0x3] %vm207_vm3, %v863_v34  ;;  %vm542_vm9 = vmor %vm540_vm8, %vm541_vm2 }
 0x9bb   :  { %877 = vst.msk [vmem:[#allocation4 + $0x6] sm:$0x3] %vm207_vm3, %v864_v35  ;;  %v537_v43 = vsub.f32 1.0, %v536_v42 }
 0x9bd   :  { %v538_v44 = vmul.f32 %v1572_v41, %v537_v43 }
 0x9be   :  { %v884_v19 = vld [vmem:[#allocation4] sm:$0x3] }
 0x9bf   :  { %v539_v45 = vadd.f32 %v1572_v41, %v538_v44 }
 0x9c1   :  { %v543_v48 = vsel %vm542_vm9, %v1572_v41, %v539_v45 }
 0x9c2   :  { %v548_v51 = vsel %vm545_vm10, %v547_v49, %v543_v48 }
 0x9c3   :  { %v562_v56 = vsub.f32 1.0, %v548_v51  ;;  %v568_v58 = vmul.f32 %v548_v51, %v1965_v15 }
 0xa19   :  { %v553_v50 = vpop.permute.xlu0 %552 }
 0xa1a   :  { %v555_v52 = vmul.f32 %v553_v50, %v548_v51 }
 0xa1c   :  { %557 = vrot.lane.b32.xlu1 %v555_v52, %s1829_s19 }
 0xa24   :  { %930 = vrot.lane.b32.xlu1 %v1544_v1, %s1829_s19 }
 0xa8e   :  { %v558_v53 = vpop.permute.xlu1 %557 }
 0xa8f   :  { %v560_v54 = vadd.f32 %v558_v53, %v507_v36 }
 0xa91   :  { %1573 = vtanh.f32 %v560_v54 }
 0xa96   :  { %v2040_v7 = vpop.permute.xlu1 %930 }
 0xa97   :  { %v1574_v55 = vpop.eup %1573 }
 0xa98   :  { %564 = vrot.lane.b32.xlu2 %v1574_v55, %s1830_s3 }
 0xaf2   :  { %v565_v57 = vpop.permute.xlu2 %564 }
 0xaf3   :  { %v567_v59 = vmul.f32 %v565_v57, %v562_v56 }
 0xaf5   :  { %v1992_v60 = vadd.f32 %v568_v58, %v567_v59 }
 0xaf7   :  { %571 = vrot.lane.b32.xlu0 %v1992_v60, %s1830_s3 }
 0xb69   :  { %v572_v2 = vpop.permute.xlu0 %571 }
 0xb6a   :  { %575 = vst.msk [vmem:[#allocation3 + $0x8] sm:$0x3] %vm118_vm0, %v572_v2  ;;  %1503 = vmatmul.msk.f32.vlgmr.msrb.gmra.mxu3 %vm218_vm1, %v572_v2 }
 0xb6b   :  { %1114 = vmatpush.msrb.mxu3 %v1996_v61 }
 0xb6d   :  { %1115 = vmatpush.msrb.mxu3 %v2000_v62 }
 0xb6f   :  { %1116 = vmatpush.msrb.mxu3 %v2005_v63 }
 0xb71   :  { %v801_v4 = vld [vmem:[#allocation3 + $0x8] sm:$0x3]  ;;  %1117 = vmatpush.msrb.mxu3 %v2008_v0 }
 0xb72   :  { %824 = vst [vmem:[#allocation1 + $0x20] ss:$4 sm:$0xff] %v801_v4  ;;  %1511 = vmatmul.msk.f32.vlgmr.msra.gmra.mxu3 %vm218_vm1, %v2028_v3 }
 0xb73   :  { %1390 = vmatpush.msra.mxu3 %v1996_v61 }
 0xb75   :  { %1391 = vmatpush.msra.mxu3 %v2000_v62 }
 0xb77   :  { %1392 = vmatpush.msra.mxu3 %v2005_v63 }
 0xb79   :  { %1393 = vmatpush.msra.mxu3 %v2008_v0 }
 0xbed   :  { %v597_v5 = vpop.f32.mrf.mxu3 }
 0xbee   :  { %v620_v6 = vadd.f32 %v597_v5, %v1927_v14  ;;  %v600_v11 = vadd.f32 %v597_v5, %v577_v10 }
 0xbf0   :  { %622 = vrot.lane.b32.xlu2 %v620_v6, %s1829_s19  ;;  %v1504_v12 = vmul.f32 -1.442695, %v600_v11  ;;  %v647_v11 = vld [vmem:[#allocation4 + $0xc] sm:$0x3] }
 0xbf2   :  { %1575 = vpow2.f32 %v1504_v12 }
 0xbf5   :  { %v905_v8 = vpop.f32.mrf.mxu3 }
 0xbf6   :  { %v933_v9 = vadd.f32 %v2040_v7, %v905_v8  ;;  %v908_v20 = vadd.f32 %v905_v8, %v884_v19 }
 0xbf8   :  { %935 = vrot.lane.b32.xlu0 %v933_v9, %s1829_s19  ;;  %v1576_v13 = vpop.eup %1575  ;;  %v1512_v22 = vmul.f32 -1.442695, %v908_v20  ;;  %v961_v20 = vld [vmem:[#allocation4 + $0x2] sm:$0x3] }
 0xbf9   :  { %v604_v15 = vadd.f32 1.0, %v1576_v13 }
 0xbfb   :  { %1577 = vrcp.f32 %v604_v15  ;;  %v616_v25 = vand.u32 2147483648, %v604_v15  ;;  %vm610_vm12 = vweird.f32 %v604_v15  ;;  %v614_v26 = vand.u32 2147483647, %v604_v15 }
 0xbfc   :  { %1579 = vpow2.f32 %v1512_v22 }
 0xbfd   :  { %v617_v29 = vor.u32 1.1754944e-38, %v616_v25  ;;  %vm615_vm14 = vcmp.eq.f32.partialorder %v614_v26, 8.507059e+37 }
 0xc01   :  { %v1578_v16 = vpop.eup %1577 }
 0xc02   :  { %v606_v18 = vmul.f32 %v1578_v16, %v604_v15  ;;  %vm611_vm11 = vweird.f32 %v1578_v16  ;;  %v1580_v27 = vpop.eup %1579 }
 0xc03   :  { %vm612_vm13 = vmor %vm610_vm12, %vm611_vm11  ;;  %v912_v30 = vadd.f32 1.0, %v1580_v27 }
 0xc04   :  { %v607_v21 = vsub.f32 1.0, %v606_v18 }
 0xc05   :  { %1581 = vrcp.f32 %v912_v30  ;;  %v924_v39 = vand.u32 2147483648, %v912_v30  ;;  %vm918_vm4 = vweird.f32 %v912_v30  ;;  %v922_v40 = vand.u32 2147483647, %v912_v30 }
 0xc06   :  { %v608_v23 = vmul.f32 %v1578_v16, %v607_v21 }
 0xc07   :  { %v925_v42 = vor.u32 1.1754944e-38, %v924_v39  ;;  %vm923_vm6 = vcmp.eq.f32.partialorder %v922_v40, 8.507059e+37 }
 0xc08   :  { %v609_v24 = vadd.f32 %v1578_v16, %v608_v23 }
 0xc0a   :  { %v613_v28 = vsel %vm612_vm13, %v1578_v16, %v609_v24 }
 0xc0b   :  { %v618_v32 = vsel %vm615_vm14, %v617_v29, %v613_v28  ;;  %v1582_v34 = vpop.eup %1581 }
 0xc0c   :  { %v914_v35 = vmul.f32 %v1582_v34, %v912_v30  ;;  %vm919_vm15 = vweird.f32 %v1582_v34  ;;  %v632_v52 = vsub.f32 1.0, %v618_v32  ;;  %v638_v54 = vmul.f32 %v618_v32, %v1992_v60 }
 0xc0d   :  { %vm920_vm5 = vmor %vm918_vm4, %vm919_vm15 }
 0xc0e   :  { %v915_v36 = vsub.f32 1.0, %v914_v35 }
 0xc10   :  { %v916_v37 = vmul.f32 %v1582_v34, %v915_v36 }
 0xc12   :  { %v917_v38 = vadd.f32 %v1582_v34, %v916_v37 }
 0xc14   :  { %v921_v41 = vsel %vm920_vm5, %v1582_v34, %v917_v38 }
 0xc15   :  { %v926_v44 = vsel %vm923_vm6, %v925_v42, %v921_v41 }
 0xc16   :  { %v945_v58 = vsub.f32 1.0, %v926_v44 }
 0xc4a   :  { %v623_v31 = vpop.permute.xlu2 %622 }
 0xc4b   :  { %v625_v33 = vmul.f32 %v623_v31, %v618_v32 }
 0xc4d   :  { %627 = vrot.lane.b32.xlu1 %v625_v33, %s1829_s19 }
 0xc6a   :  { %v936_v43 = vpop.permute.xlu0 %935 }
 0xc6b   :  { %v938_v45 = vmul.f32 %v936_v43, %v926_v44 }
 0xc6d   :  { %940 = vrot.lane.b32.xlu2 %v938_v45, %s1829_s19 }
 0xc75   :  { %951 = vrot.lane.b32.xlu2 %v2028_v3, %s1824_s11 }
 0xcbf   :  { %v628_v46 = vpop.permute.xlu1 %627 }
 0xcc0   :  { %v630_v47 = vadd.f32 %v628_v46, %v577_v10 }
 0xcc2   :  { %1583 = vtanh.f32 %v630_v47 }
 0xcc7   :  { %v941_v48 = vpop.permute.xlu2 %940 }
 0xcc8   :  { %v1584_v49 = vpop.eup %1583  ;;  %v943_v50 = vadd.f32 %v941_v48, %v884_v19 }
 0xcc9   :  { %634 = vrot.lane.b32.xlu0 %v1584_v49, %s1830_s3 }
 0xcca   :  { %1585 = vtanh.f32 %v943_v50 }
 0xccf   :  { %v952_v57 = vpop.permute.xlu2 %951 }
 0xcd0   :  { %v1586_v51 = vpop.eup %1585  ;;  %v954_v1 = vmul.f32 %v952_v57, %v926_v44 }
 0xcd1   :  { %947 = vrot.lane.b32.xlu1 %v1586_v51, %s1830_s3 }
 0xd3b   :  { %v635_v53 = vpop.permute.xlu0 %634 }
 0xd3c   :  { %v637_v55 = vmul.f32 %v635_v53, %v632_v52 }
 0xd3e   :  { %v2051_v56 = vadd.f32 %v638_v54, %v637_v55 }
 0xd40   :  { %641 = vrot.lane.b32.xlu0 %v2051_v56, %s1830_s3 }
 0xd43   :  { %v948_v59 = vpop.permute.xlu1 %947 }
 0xd44   :  { %v950_v2 = vmul.f32 %v948_v59, %v945_v58 }
 0xd46   :  { %v2055_v3 = vadd.f32 %v954_v1, %v950_v2 }
 0xd48   :  { %957 = vrot.lane.b32.xlu1 %v2055_v3, %s1830_s3 }
 0xdb2   :  { %v642_v4 = vpop.permute.xlu0 %641 }
 0xdb3   :  { %645 = vst.msk [vmem:[#allocation3 + $0xa] sm:$0x3] %vm118_vm0, %v642_v4  ;;  %1505 = vmatmul.msk.f32.vlgmr.msrb.gmra.mxu0 %vm218_vm1, %v642_v4 }
 0xdb4   :  { %1183 = vmatpush.msrb.mxu0 %v1996_v61 }
 0xdb6   :  { %1184 = vmatpush.msrb.mxu0 %v2000_v62 }
 0xdb8   :  { %1185 = vmatpush.msrb.mxu0 %v2005_v63 }
 0xdba   :  { %v802_v60 = vld [vmem:[#allocation3 + $0xa] sm:$0x3]  ;;  %v958_v5 = vpop.permute.xlu1 %957  ;;  %1186 = vmatpush.msrb.mxu0 %v2008_v0 }
 0xdbb   :  { %826 = vst [vmem:[#allocation1 + $0x21] ss:$4 sm:$0xff] %v802_v60  ;;  %1513 = vmatmul.msk.f32.vlgmr.msra.gmra.mxu0 %vm218_vm1, %v958_v5 }
 0xdbc   :  { %960 = vst.msk [vmem:[#allocation14] sm:$0x3] %vm118_vm0, %v958_v5 }
 0xe30   :  { %v667_v6 = vpop.f32.mrf.mxu0 }
 0xe31   :  { %v690_v8 = vadd.f32 %v667_v6, %v1927_v14  ;;  %v670_v12 = vadd.f32 %v667_v6, %v647_v11 }
 0xe33   :  { %692 = vrot.lane.b32.xlu2 %v690_v8, %s1829_s19  ;;  %v1506_v13 = vmul.f32 -1.442695, %v670_v12 }
 0xe35   :  { %1587 = vpow2.f32 %v1506_v13 }
 0xe38   :  { %v981_v9 = vpop.f32.mrf.mxu0 }
 0xe39   :  { %v1004_v10 = vadd.f32 %v981_v9, %v2040_v7  ;;  %v984_v21 = vadd.f32 %v981_v9, %v961_v20 }
 0xe3b   :  { %1006 = vrot.lane.b32.xlu0 %v1004_v10, %s1829_s19  ;;  %v1588_v15 = vpop.eup %1587  ;;  %v1514_v23 = vmul.f32 -1.442695, %v984_v21 }
 0xe3c   :  { %v674_v16 = vadd.f32 1.0, %v1588_v15 }
 0xe3e   :  { %1589 = vrcp.f32 %v674_v16  ;;  %v686_v26 = vand.u32 2147483648, %v674_v16  ;;  %vm680_vm2 = vweird.f32 %v674_v16  ;;  %v684_v27 = vand.u32 2147483647, %v674_v16 }
 0xe3f   :  { %1591 = vpow2.f32 %v1514_v23 }
 0xe40   :  { %v687_v30 = vor.u32 1.1754944e-38, %v686_v26  ;;  %vm685_vm9 = vcmp.eq.f32.partialorder %v684_v27, 8.507059e+37 }
 0xe44   :  { %v1590_v18 = vpop.eup %1589 }
 0xe45   :  { %v676_v19 = vmul.f32 %v1590_v18, %v674_v16  ;;  %vm681_vm7 = vweird.f32 %v1590_v18  ;;  %v1592_v28 = vpop.eup %1591 }
 0xe46   :  { %vm682_vm8 = vmor %vm680_vm2, %vm681_vm7  ;;  %v988_v31 = vadd.f32 1.0, %v1592_v28 }
 0xe47   :  { %v677_v22 = vsub.f32 1.0, %v676_v19 }
 0xe48   :  { %1593 = vrcp.f32 %v988_v31  ;;  %v1000_v40 = vand.u32 2147483648, %v988_v31  ;;  %vm994_vm11 = vweird.f32 %v988_v31  ;;  %v998_v41 = vand.u32 2147483647, %v988_v31 }
 0xe49   :  { %v678_v24 = vmul.f32 %v1590_v18, %v677_v22 }
 0xe4a   :  { %v1001_v43 = vor.u32 1.1754944e-38, %v1000_v40  ;;  %vm999_vm13 = vcmp.eq.f32.partialorder %v998_v41, 8.507059e+37 }
 0xe4b   :  { %v679_v25 = vadd.f32 %v1590_v18, %v678_v24 }
 0xe4d   :  { %v683_v29 = vsel %vm682_vm8, %v1590_v18, %v679_v25 }
 0xe4e   :  { %v688_v32 = vsel %vm685_vm9, %v687_v30, %v683_v29  ;;  %v1594_v35 = vpop.eup %1593  ;;  %v717_v29 = vld [vmem:[#allocation4 + $0xe] sm:$0x3] }
 0xe4f   :  { %v990_v36 = vmul.f32 %v1594_v35, %v988_v31  ;;  %vm995_vm10 = vweird.f32 %v1594_v35  ;;  %v702_v53 = vsub.f32 1.0, %v688_v32  ;;  %v708_v55 = vmul.f32 %v688_v32, %v2051_v56 }
 0xe50   :  { %vm996_vm12 = vmor %vm994_vm11, %vm995_vm10 }
 0xe51   :  { %v991_v37 = vsub.f32 1.0, %v990_v36 }
 0xe53   :  { %v992_v38 = vmul.f32 %v1594_v35, %v991_v37 }
 0xe55   :  { %v993_v39 = vadd.f32 %v1594_v35, %v992_v38 }
 0xe57   :  { %v997_v42 = vsel %vm996_vm12, %v1594_v35, %v993_v39 }
 0xe58   :  { %v1002_v45 = vsel %vm999_vm13, %v1001_v43, %v997_v42 }
 0xe59   :  { %v1016_v59 = vsub.f32 1.0, %v1002_v45  ;;  %v1022_v2 = vmul.f32 %v1002_v45, %v2055_v3 }
 0xe8d   :  { %v693_v33 = vpop.permute.xlu2 %692 }
 0xe8e   :  { %v695_v34 = vmul.f32 %v693_v33, %v688_v32 }
 0xe90   :  { %697 = vrot.lane.b32.xlu1 %v695_v34, %s1829_s19 }
 0xead   :  { %v1007_v44 = vpop.permute.xlu0 %1006 }
 0xeae   :  { %v1009_v46 = vmul.f32 %v1007_v44, %v1002_v45 }
 0xeb0   :  { %1011 = vrot.lane.b32.xlu2 %v1009_v46, %s1829_s19 }
 0xf02   :  { %v698_v47 = vpop.permute.xlu1 %697 }
 0xf03   :  { %v700_v48 = vadd.f32 %v698_v47, %v647_v11 }
 0xf05   :  { %1595 = vtanh.f32 %v700_v48 }
 0xf0a   :  { %v1012_v49 = vpop.permute.xlu2 %1011 }
 0xf0b   :  { %v1596_v50 = vpop.eup %1595  ;;  %v1014_v51 = vadd.f32 %v1012_v49, %v961_v20 }
 0xf0c   :  { %704 = vrot.lane.b32.xlu0 %v1596_v50, %s1830_s3 }
 0xf0d   :  { %1597 = vtanh.f32 %v1014_v51 }
 0xf13   :  { %v1598_v52 = vpop.eup %1597 }
 0xf14   :  { %1018 = vrot.lane.b32.xlu1 %v1598_v52, %s1830_s3 }
 0xf7e   :  { %v705_v54 = vpop.permute.xlu0 %704 }
 0xf7f   :  { %v707_v57 = vmul.f32 %v705_v54, %v702_v53 }
 0xf81   :  { %v2076_v58 = vadd.f32 %v708_v55, %v707_v57  ;;  %v1099_v57 = vld [vmem:[#allocation4 + $0x6] sm:$0x3] }
 0xf83   :  { %711 = vrot.lane.b32.xlu2 %v2076_v58, %s1830_s3 }
 0xf86   :  { %v1019_v1 = vpop.permute.xlu1 %1018 }
 0xf87   :  { %v1021_v4 = vmul.f32 %v1019_v1, %v1016_v59 }
 0xf89   :  { %v1023_v60 = vadd.f32 %v1022_v2, %v1021_v4 }
 0xf8b   :  { %1025 = vrot.lane.b32.xlu0 %v1023_v60, %s1830_s3 }
 0xfdd   :  { %v712_v5 = vpop.permute.xlu2 %711 }
 0xfde   :  { %715 = vst.msk [vmem:[#allocation3 + $0xc] sm:$0x3] %vm118_vm0, %v712_v5  ;;  %1507 = vmatmul.msk.f32.vlgmr.msra.gmra.mxu1 %vm218_vm1, %v712_v5 }
 0xfdf   :  { %1252 = vmatpush.msra.mxu1 %v1996_v61  ;;  %v1030_v61 = vld [vmem:[#allocation4 + $0x4] sm:$0x3] }
 0xfe1   :  { %1253 = vmatpush.msra.mxu1 %v2000_v62 }
 0xfe3   :  { %1254 = vmatpush.msra.mxu1 %v2005_v63 }
 0xfe5   :  { %v803_v56 = vld [vmem:[#allocation3 + $0xc] sm:$0x3]  ;;  %1255 = vmatpush.msra.mxu1 %v2008_v0 }
 0xfe6   :  { %828 = vst [vmem:[#allocation1 + $0x22] ss:$4 sm:$0xff] %v803_v56 }
 0xffd   :  { %v1026_v3 = vpop.permute.xlu0 %1025 }
 0xffe   :  { %1029 = vst.msk [vmem:[#allocation14 + $0x2] sm:$0x3] %vm118_vm0, %v1026_v3  ;;  %1515 = vmatmul.msk.f32.vlgmr.msrb.gmra.mxu1 %vm218_vm1, %v1026_v3 }
0x105b   :  { %v737_v6 = vpop.f32.mrf.mxu1 }
0x105c   :  { %v760_v25 = vadd.f32 %v737_v6, %v1927_v14  ;;  %v740_v30 = vadd.f32 %v737_v6, %v717_v29 }
0x105e   :  { %v1508_v31 = vmul.f32 -1.442695, %v740_v30 }
0x107b   :  { %v1050_v8 = vpop.f32.mrf.mxu1 }
0x107c   :  { %v1073_v9 = vadd.f32 %v1050_v8, %v2040_v7  ;;  %v1053_v10 = vadd.f32 %v1050_v8, %v1030_v61 }
0x107e   :  { %1075 = vrot.lane.b32.xlu1 %v1073_v9, %s1829_s19  ;;  %v1516_v62 = vmul.f32 -1.442695, %v1053_v10 }
0x1080   :  { %1599 = vpow2.f32 %v1516_v62 }
0x1086   :  { %v1600_v63 = vpop.eup %1599 }
0x1087   :  { %v1057_v11 = vadd.f32 1.0, %v1600_v63 }
0x1089   :  { %1601 = vrcp.f32 %v1057_v11  ;;  %v1069_v18 = vand.u32 2147483648, %v1057_v11  ;;  %vm1063_vm15 = vweird.f32 %v1057_v11  ;;  %v1067_v19 = vand.u32 2147483647, %v1057_v11 }
0x108b   :  { %v1070_v21 = vor.u32 1.1754944e-38, %v1069_v18  ;;  %vm1068_vm5 = vcmp.eq.f32.partialorder %v1067_v19, 8.507059e+37 }
0x108f   :  { %v1602_v0 = vpop.eup %1601 }
0x1090   :  { %v1059_v12 = vmul.f32 %v1602_v0, %v1057_v11  ;;  %vm1064_vm14 = vweird.f32 %v1602_v0 }
0x1091   :  { %vm1065_vm4 = vmor %vm1063_vm15, %vm1064_vm14 }
0x1092   :  { %v1060_v13 = vsub.f32 1.0, %v1059_v12 }
0x1094   :  { %v1061_v15 = vmul.f32 %v1602_v0, %v1060_v13 }
0x1096   :  { %v1062_v16 = vadd.f32 %v1602_v0, %v1061_v15 }
0x1098   :  { %v1066_v20 = vsel %vm1065_vm4, %v1602_v0, %v1062_v16 }
0x1099   :  { %v1071_v23 = vsel %vm1068_vm5, %v1070_v21, %v1066_v20 }
0x109a   :  { %v1085_v14 = vsub.f32 1.0, %v1071_v23  ;;  %v1091_v39 = vmul.f32 %v1071_v23, %v1023_v60 }
0x10f0   :  { %v1076_v22 = vpop.permute.xlu1 %1075 }
0x10f1   :  { %v1078_v24 = vmul.f32 %v1076_v22, %v1071_v23 }
0x10f3   :  { %1080 = vrot.lane.b32.xlu2 %v1078_v24, %s1829_s19 }
0x10fb   :  { %762 = vrot.lane.b32.xlu2 %v760_v25, %s1829_s19 }
0x114d   :  { %v1081_v26 = vpop.permute.xlu2 %1080 }
0x114e   :  { %v1083_v27 = vadd.f32 %v1081_v26, %v1030_v61 }
0x1150   :  { %1603 = vtanh.f32 %v1083_v27 }
0x1151   :  { %1605 = vpow2.f32 %v1508_v31 }
0x1155   :  { %v763_v46 = vpop.permute.xlu2 %762 }
0x1156   :  { %v1604_v28 = vpop.eup %1603 }
0x1157   :  { %1087 = vrot.lane.b32.xlu0 %v1604_v28, %s1830_s3  ;;  %v1606_v32 = vpop.eup %1605 }
0x1158   :  { %v744_v33 = vadd.f32 1.0, %v1606_v32 }
0x115a   :  { %1607 = vrcp.f32 %v744_v33  ;;  %v756_v43 = vand.u32 2147483648, %v744_v33  ;;  %vm750_vm7 = vweird.f32 %v744_v33  ;;  %v754_v44 = vand.u32 2147483647, %v744_v33 }
0x115c   :  { %v757_v47 = vor.u32 1.1754944e-38, %v756_v43  ;;  %vm755_vm8 = vcmp.eq.f32.partialorder %v754_v44, 8.507059e+37 }
0x1160   :  { %v1608_v34 = vpop.eup %1607 }
0x1161   :  { %v746_v35 = vmul.f32 %v1608_v34, %v744_v33  ;;  %vm751_vm6 = vweird.f32 %v1608_v34 }
0x1162   :  { %vm752_vm2 = vmor %vm750_vm7, %vm751_vm6 }
0x1163   :  { %v747_v36 = vsub.f32 1.0, %v746_v35 }
0x1165   :  { %v748_v37 = vmul.f32 %v1608_v34, %v747_v36 }
0x1167   :  { %v749_v41 = vadd.f32 %v1608_v34, %v748_v37 }
0x1169   :  { %v753_v45 = vsel %vm752_vm2, %v1608_v34, %v749_v41 }
0x116a   :  { %v758_v48 = vsel %vm755_vm8, %v757_v47, %v753_v45 }
0x116b   :  { %v765_v49 = vmul.f32 %v763_v46, %v758_v48  ;;  %v772_v0 = vsub.f32 1.0, %v758_v48  ;;  %v778_v13 = vmul.f32 %v758_v48, %v2076_v58 }
0x11c9   :  { %v1088_v38 = vpop.permute.xlu0 %1087 }
0x11ca   :  { %v1090_v40 = vmul.f32 %v1088_v38, %v1085_v14 }
0x11cc   :  { %v2096_v42 = vadd.f32 %v1091_v39, %v1090_v40 }
0x11ce   :  { %1094 = vrot.lane.b32.xlu1 %v2096_v42, %s1830_s3 }
0x11d6   :  { %767 = vrot.lane.b32.xlu1 %v765_v49, %s1829_s19 }
0x1240   :  { %v1095_v50 = vpop.permute.xlu1 %1094 }
0x1241   :  { %1098 = vst.msk [vmem:[#allocation14 + $0x4] sm:$0x3] %vm118_vm0, %v1095_v50  ;;  %1517 = vmatmul.msk.f32.vlgmr.msrb.gmra.mxu3 %vm218_vm1, %v1095_v50 }
0x1248   :  { %v768_v51 = vpop.permute.xlu1 %767 }
0x1249   :  { %v770_v52 = vadd.f32 %v768_v51, %v717_v29 }
0x124b   :  { %1609 = vtanh.f32 %v770_v52 }
0x1251   :  { %v1610_v55 = vpop.eup %1609 }
0x12c4   :  { %v1119_v53 = vpop.f32.mrf.mxu3 }
0x12c5   :  { %v1142_v54 = vadd.f32 %v1119_v53, %v2040_v7  ;;  %v1122_v59 = vadd.f32 %v1119_v53, %v1099_v57 }
0x12c7   :  { %1144 = vrot.lane.b32.xlu0 %v1142_v54, %s1829_s19  ;;  %v1518_v1 = vmul.f32 -1.442695, %v1122_v59 }
0x12c9   :  { %1611 = vpow2.f32 %v1518_v1 }
0x12cf   :  { %774 = vrot.lane.b32.xlu0 %v1610_v55, %s1830_s3  ;;  %v1612_v2 = vpop.eup %1611 }
0x12d0   :  { %v1126_v4 = vadd.f32 1.0, %v1612_v2 }
0x12d2   :  { %1613 = vrcp.f32 %v1126_v4  ;;  %v1138_v8 = vand.u32 2147483648, %v1126_v4  ;;  %vm1132_vm10 = vweird.f32 %v1126_v4  ;;  %v1136_v9 = vand.u32 2147483647, %v1126_v4 }
0x12d4   :  { %v1139_v10 = vor.u32 1.1754944e-38, %v1138_v8  ;;  %vm1137_vm12 = vcmp.eq.f32.partialorder %v1136_v9, 8.507059e+37 }
0x12d8   :  { %v1614_v60 = vpop.eup %1613 }
0x12d9   :  { %v1128_v5 = vmul.f32 %v1614_v60, %v1126_v4  ;;  %vm1133_vm9 = vweird.f32 %v1614_v60 }
0x12da   :  { %vm1134_vm11 = vmor %vm1132_vm10, %vm1133_vm9 }
0x12db   :  { %v1129_v56 = vsub.f32 1.0, %v1128_v5 }
0x12dd   :  { %v1130_v3 = vmul.f32 %v1614_v60, %v1129_v56 }
0x12df   :  { %v1131_v6 = vadd.f32 %v1614_v60, %v1130_v3 }
0x12e1   :  { %v1135_v61 = vsel %vm1134_vm11, %v1614_v60, %v1131_v6 }
0x12e2   :  { %v1140_v63 = vsel %vm1137_vm12, %v1139_v10, %v1135_v61 }
0x12e3   :  { %v1154_v24 = vsub.f32 1.0, %v1140_v63  ;;  %v1160_v26 = vmul.f32 %v1140_v63, %v2096_v42 }
0x1339   :  { %v1145_v62 = vpop.permute.xlu0 %1144 }
0x133a   :  { %v1147_v11 = vmul.f32 %v1145_v62, %v1140_v63 }
0x133c   :  { %1149 = vrot.lane.b32.xlu2 %v1147_v11, %s1829_s19 }
0x1341   :  { %v775_v12 = vpop.permute.xlu0 %774 }
0x1342   :  { %v777_v15 = vmul.f32 %v775_v12, %v772_v0 }
0x1344   :  { %v779_v16 = vadd.f32 %v778_v13, %v777_v15 }
0x1346   :  { %781 = vrot.lane.b32.xlu2 %v779_v16, %s1830_s3 }
0x1396   :  { %v1150_v18 = vpop.permute.xlu2 %1149 }
0x1397   :  { %v1152_v19 = vadd.f32 %v1150_v18, %v1099_v57 }
0x1399   :  { %1615 = vtanh.f32 %v1152_v19 }
0x139f   :  { %v1616_v20 = vpop.eup %1615 }
0x13a0   :  { %1156 = vrot.lane.b32.xlu1 %v1616_v20, %s1830_s3  ;;  %v782_v21 = vpop.permute.xlu2 %781 }
0x13a1   :  { %785 = vst.msk [vmem:[#allocation3 + $0xe] sm:$0x3] %vm118_vm0, %v782_v21 }
0x13a2   :  { %786 = vst.msk [vmem:[#allocation2] sm:$0x3] %vm118_vm0, %v782_v21 }
0x13a8   :  { %v804_v22 = vld [vmem:[#allocation3 + $0xe] sm:$0x3] }
0x13a9   :  { %830 = vst [vmem:[#allocation1 + $0x23] ss:$4 sm:$0xff] %v804_v22  ;;  %v1448_v23 = vld [vmem:[#allocation2] sm:$0x3] }
0x13aa   :  { %1450 = vst.msk [vmem:[#allocation15] sm:$0x3] %vm118_vm0, %v1448_v23 }
0x13b0   :  { %v832_v58 = vld.sshfl [vmem:[#allocation1 + $0x20] sm:$0xff pattern:$0x73625140] }
0x13b1   :  { %1510 = vmatmul.msk.f32.gmra.mxu2 %vm218_vm1, %v832_v58 }
0x1412   :  { %v1157_v25 = vpop.permute.xlu1 %1156 }
0x1413   :  { %v1159_v27 = vmul.f32 %v1157_v25, %v1154_v24 }
0x1415   :  { %v1161_v28 = vadd.f32 %v1160_v26, %v1159_v27 }
0x1417   :  { %1163 = vrot.lane.b32.xlu0 %v1161_v28, %s1830_s3 }
0x1434   :  { %v857_v29 = vpop.f32.mrf.mxu2 }
0x1435   :  { %v858_v30 = vadd.f32 %v1982_v17, %v857_v29 }
0x1437   :  { %v865_v31 = vrot.slane %v858_v30, 2  ;;  %v866_v32 = vrot.slane %v858_v30, 4  ;;  %v867_v33 = vrot.slane %v858_v30, 6  ;;  %878 = vst.msk [vmem:[#allocation4 + $0x8] sm:$0x3] %vm207_vm3, %v858_v30 }
0x1439   :  { %879 = vst.msk [vmem:[#allocation4 + $0xa] sm:$0x3] %vm207_vm3, %v865_v31 }
0x143a   :  { %880 = vst.msk [vmem:[#allocation4 + $0xc] sm:$0x3] %vm207_vm3, %v866_v32 }
0x143b   :  { %881 = vst.msk [vmem:[#allocation4 + $0xe] sm:$0x3] %vm207_vm3, %v867_v33 }
0x143e   :  { %v1168_v17 = vld [vmem:[#allocation4 + $0x8] sm:$0x3] }
0x1440   :  { %v1237_v56 = vld [vmem:[#allocation4 + $0xa] sm:$0x3] }
0x1441   :  { %v1306_v30 = vld [vmem:[#allocation4 + $0xc] sm:$0x3] }
0x1489   :  { %v1164_v34 = vpop.permute.xlu0 %1163 }
0x148a   :  { %1167 = vst.msk [vmem:[#allocation14 + $0x6] sm:$0x3] %vm118_vm0, %v1164_v34  ;;  %1519 = vmatmul.msk.f32.vlgmr.msrb.gmra.mxu0 %vm218_vm1, %v1164_v34 }
0x1507   :  { %v1188_v35 = vpop.f32.mrf.mxu0 }
0x1508   :  { %v1211_v36 = vadd.f32 %v1188_v35, %v2040_v7  ;;  %v1191_v37 = vadd.f32 %v1188_v35, %v1168_v17 }
0x150a   :  { %1213 = vrot.lane.b32.xlu1 %v1211_v36, %s1829_s19  ;;  %v1520_v14 = vmul.f32 -1.442695, %v1191_v37 }
0x150c   :  { %1617 = vpow2.f32 %v1520_v14 }
0x1512   :  { %v1618_v38 = vpop.eup %1617 }
0x1513   :  { %v1195_v39 = vadd.f32 1.0, %v1618_v38 }
0x1515   :  { %1619 = vrcp.f32 %v1195_v39  ;;  %v1207_v45 = vand.u32 2147483648, %v1195_v39  ;;  %vm1201_vm13 = vweird.f32 %v1195_v39  ;;  %v1205_v46 = vand.u32 2147483647, %v1195_v39 }
0x1517   :  { %v1208_v48 = vor.u32 1.1754944e-38, %v1207_v45  ;;  %vm1206_vm15 = vcmp.eq.f32.partialorder %v1205_v46, 8.507059e+37 }
0x151b   :  { %v1620_v40 = vpop.eup %1619 }
0x151c   :  { %v1197_v41 = vmul.f32 %v1620_v40, %v1195_v39  ;;  %vm1202_vm3 = vweird.f32 %v1620_v40 }
0x151d   :  { %vm1203_vm14 = vmor %vm1201_vm13, %vm1202_vm3 }
0x151e   :  { %v1198_v42 = vsub.f32 1.0, %v1197_v41 }
0x1520   :  { %v1199_v43 = vmul.f32 %v1620_v40, %v1198_v42 }
0x1522   :  { %v1200_v44 = vadd.f32 %v1620_v40, %v1199_v43 }
0x1524   :  { %v1204_v47 = vsel %vm1203_vm14, %v1620_v40, %v1200_v44 }
0x1525   :  { %v1209_v50 = vsel %vm1206_vm15, %v1208_v48, %v1204_v47 }
0x1526   :  { %v1223_v55 = vsub.f32 1.0, %v1209_v50  ;;  %v1229_v59 = vmul.f32 %v1209_v50, %v1161_v28 }
0x157c   :  { %v1214_v49 = vpop.permute.xlu1 %1213 }
0x157d   :  { %v1216_v51 = vmul.f32 %v1214_v49, %v1209_v50 }
0x157f   :  { %1218 = vrot.lane.b32.xlu2 %v1216_v51, %s1829_s19 }
0x15d9   :  { %v1219_v52 = vpop.permute.xlu2 %1218 }
0x15da   :  { %v1221_v53 = vadd.f32 %v1219_v52, %v1168_v17 }
0x15dc   :  { %1621 = vtanh.f32 %v1221_v53 }
0x15e2   :  { %v1622_v54 = vpop.eup %1621 }
0x15e3   :  { %1225 = vrot.lane.b32.xlu0 %v1622_v54, %s1830_s3 }
0x1655   :  { %v1226_v57 = vpop.permute.xlu0 %1225 }
0x1656   :  { %v1228_v1 = vmul.f32 %v1226_v57, %v1223_v55  ;;  %v1375_v57 = vld [vmem:[#allocation4 + $0xe] sm:$0x3] }
0x1658   :  { %v1230_v2 = vadd.f32 %v1229_v59, %v1228_v1 }
0x165a   :  { %1232 = vrot.lane.b32.xlu1 %v1230_v2, %s1830_s3 }
0x16cc   :  { %v1233_v4 = vpop.permute.xlu1 %1232 }
0x16cd   :  { %1236 = vst.msk [vmem:[#allocation14 + $0x8] sm:$0x3] %vm118_vm0, %v1233_v4  ;;  %1521 = vmatmul.msk.f32.vlgmr.msra.gmra.mxu1 %vm218_vm1, %v1233_v4 }
0x174a   :  { %v1257_v60 = vpop.f32.mrf.mxu1 }
0x174b   :  { %v1280_v5 = vadd.f32 %v1257_v60, %v2040_v7  ;;  %v1260_v3 = vadd.f32 %v1257_v60, %v1237_v56 }
0x174d   :  { %1282 = vrot.lane.b32.xlu2 %v1280_v5, %s1829_s19  ;;  %v1522_v6 = vmul.f32 -1.442695, %v1260_v3 }
0x174f   :  { %1623 = vpow2.f32 %v1522_v6 }
0x1755   :  { %v1624_v8 = vpop.eup %1623 }
0x1756   :  { %v1264_v9 = vadd.f32 1.0, %v1624_v8 }
0x1758   :  { %1625 = vrcp.f32 %v1264_v9  ;;  %v1276_v0 = vand.u32 2147483648, %v1264_v9  ;;  %vm1270_vm5 = vweird.f32 %v1264_v9  ;;  %v1274_v12 = vand.u32 2147483647, %v1264_v9 }
0x175a   :  { %v1277_v15 = vor.u32 1.1754944e-38, %v1276_v0  ;;  %vm1275_vm7 = vcmp.eq.f32.partialorder %v1274_v12, 8.507059e+37 }
0x175e   :  { %v1626_v61 = vpop.eup %1625 }
0x175f   :  { %v1266_v10 = vmul.f32 %v1626_v61, %v1264_v9  ;;  %vm1271_vm4 = vweird.f32 %v1626_v61 }
0x1760   :  { %vm1272_vm6 = vmor %vm1270_vm5, %vm1271_vm4 }
0x1761   :  { %v1267_v62 = vsub.f32 1.0, %v1266_v10 }
0x1763   :  { %v1268_v63 = vmul.f32 %v1626_v61, %v1267_v62 }
0x1765   :  { %v1269_v11 = vadd.f32 %v1626_v61, %v1268_v63 }
0x1767   :  { %v1273_v13 = vsel %vm1272_vm6, %v1626_v61, %v1269_v11 }
0x1768   :  { %v1278_v18 = vsel %vm1275_vm7, %v1277_v15, %v1273_v13 }
0x1769   :  { %v1292_v23 = vsub.f32 1.0, %v1278_v18  ;;  %v1298_v24 = vmul.f32 %v1278_v18, %v1230_v2 }
0x17a7   :  { %v1283_v16 = vpop.permute.xlu2 %1282 }
0x17a8   :  { %v1285_v19 = vmul.f32 %v1283_v16, %v1278_v18 }
0x17aa   :  { %1287 = vrot.lane.b32.xlu0 %v1285_v19, %s1829_s19 }
0x181c   :  { %v1288_v20 = vpop.permute.xlu0 %1287 }
0x181d   :  { %v1290_v21 = vadd.f32 %v1288_v20, %v1237_v56 }
0x181f   :  { %1627 = vtanh.f32 %v1290_v21 }
0x1825   :  { %v1628_v22 = vpop.eup %1627 }
0x1826   :  { %1294 = vrot.lane.b32.xlu1 %v1628_v22, %s1830_s3 }
0x1898   :  { %v1295_v58 = vpop.permute.xlu1 %1294 }
0x1899   :  { %v1297_v25 = vmul.f32 %v1295_v58, %v1292_v23 }
0x189b   :  { %v1299_v26 = vadd.f32 %v1298_v24, %v1297_v25 }
0x189d   :  { %1301 = vrot.lane.b32.xlu2 %v1299_v26, %s1830_s3 }
0x18f7   :  { %v1302_v27 = vpop.permute.xlu2 %1301 }
0x18f8   :  { %1305 = vst.msk [vmem:[#allocation14 + $0xa] sm:$0x3] %vm118_vm0, %v1302_v27  ;;  %1523 = vmatmul.msk.f32.vlgmr.msrb.gmra.mxu2 %vm218_vm1, %v1302_v27 }
0x197b   :  { %v1326_v28 = vpop.f32.mrf.mxu2 }
0x197c   :  { %v1349_v29 = vadd.f32 %v1326_v28, %v2040_v7  ;;  %v1329_v31 = vadd.f32 %v1326_v28, %v1306_v30 }
0x197e   :  { %1351 = vrot.lane.b32.xlu0 %v1349_v29, %s1829_s19  ;;  %v1524_v32 = vmul.f32 -1.442695, %v1329_v31 }
0x1980   :  { %1629 = vpow2.f32 %v1524_v32 }
0x1986   :  { %v1630_v33 = vpop.eup %1629 }
0x1987   :  { %v1333_v34 = vadd.f32 1.0, %v1630_v33 }
0x1989   :  { %1631 = vrcp.f32 %v1333_v34  ;;  %v1345_v38 = vand.u32 2147483648, %v1333_v34  ;;  %vm1339_vm8 = vweird.f32 %v1333_v34  ;;  %v1343_v39 = vand.u32 2147483647, %v1333_v34 }
0x198b   :  { %v1346_v41 = vor.u32 1.1754944e-38, %v1345_v38  ;;  %vm1344_vm10 = vcmp.eq.f32.partialorder %v1343_v39, 8.507059e+37 }
0x198f   :  { %v1632_v35 = vpop.eup %1631 }
0x1990   :  { %v1335_v36 = vmul.f32 %v1632_v35, %v1333_v34  ;;  %vm1340_vm2 = vweird.f32 %v1632_v35 }
0x1991   :  { %vm1341_vm9 = vmor %vm1339_vm8, %vm1340_vm2 }
0x1992   :  { %v1336_v17 = vsub.f32 1.0, %v1335_v36 }
0x1994   :  { %v1337_v37 = vmul.f32 %v1632_v35, %v1336_v17 }
0x1996   :  { %v1338_v14 = vadd.f32 %v1632_v35, %v1337_v37 }
0x1998   :  { %v1342_v40 = vsel %vm1341_vm9, %v1632_v35, %v1338_v14 }
0x1999   :  { %v1347_v43 = vsel %vm1344_vm10, %v1346_v41, %v1342_v40 }
0x199a   :  { %v1361_v48 = vsub.f32 1.0, %v1347_v43  ;;  %v1367_v50 = vmul.f32 %v1347_v43, %v1299_v26 }
0x19f0   :  { %v1352_v42 = vpop.permute.xlu0 %1351 }
0x19f1   :  { %v1354_v44 = vmul.f32 %v1352_v42, %v1347_v43 }
0x19f3   :  { %1356 = vrot.lane.b32.xlu1 %v1354_v44, %s1829_s19 }
0x1a65   :  { %v1357_v45 = vpop.permute.xlu1 %1356 }
0x1a66   :  { %v1359_v46 = vadd.f32 %v1357_v45, %v1306_v30 }
0x1a68   :  { %1633 = vtanh.f32 %v1359_v46 }
0x1a6e   :  { %v1634_v47 = vpop.eup %1633 }
0x1a6f   :  { %1363 = vrot.lane.b32.xlu2 %v1634_v47, %s1830_s3 }
0x1ac9   :  { %v1364_v49 = vpop.permute.xlu2 %1363 }
0x1aca   :  { %v1366_v51 = vmul.f32 %v1364_v49, %v1361_v48 }
0x1acc   :  { %v1368_v52 = vadd.f32 %v1367_v50, %v1366_v51 }
0x1ace   :  { %1370 = vrot.lane.b32.xlu0 %v1368_v52, %s1830_s3 }
0x1b40   :  { %v1371_v53 = vpop.permute.xlu0 %1370 }
0x1b41   :  { %1374 = vst.msk [vmem:[#allocation14 + $0xc] sm:$0x3] %vm118_vm0, %v1371_v53  ;;  %1525 = vmatmul.msk.f32.vlgmr.msra.gmra.mxu3 %vm218_vm1, %v1371_v53 }
0x1bc4   :  { %v1395_v54 = vpop.f32.mrf.mxu3 }
0x1bc5   :  { %v1418_v55 = vadd.f32 %v1395_v54, %v2040_v7  ;;  %v1398_v59 = vadd.f32 %v1395_v54, %v1375_v57 }
0x1bc7   :  { %1420 = vrot.lane.b32.xlu1 %v1418_v55, %s1829_s19  ;;  %v1526_v1 = vmul.f32 -1.442695, %v1398_v59 }
0x1bc9   :  { %1635 = vpow2.f32 %v1526_v1 }
0x1bcf   :  { %v1636_v2 = vpop.eup %1635 }
0x1bd0   :  { %v1402_v4 = vadd.f32 1.0, %v1636_v2 }
0x1bd2   :  { %1637 = vrcp.f32 %v1402_v4  ;;  %v1414_v8 = vand.u32 2147483648, %v1402_v4  ;;  %vm1408_vm1 = vweird.f32 %v1402_v4  ;;  %v1412_v9 = vand.u32 2147483647, %v1402_v4 }
0x1bd4   :  { %v1415_v61 = vor.u32 1.1754944e-38, %v1414_v8  ;;  %vm1413_vm3 = vcmp.eq.f32.partialorder %v1412_v9, 8.507059e+37 }
0x1bd8   :  { %v1638_v60 = vpop.eup %1637 }
0x1bd9   :  { %v1404_v5 = vmul.f32 %v1638_v60, %v1402_v4  ;;  %vm1409_vm11 = vweird.f32 %v1638_v60 }
0x1bda   :  { %vm1410_vm12 = vmor %vm1408_vm1, %vm1409_vm11 }
0x1bdb   :  { %v1405_v56 = vsub.f32 1.0, %v1404_v5 }
0x1bdd   :  { %v1406_v3 = vmul.f32 %v1638_v60, %v1405_v56 }
0x1bdf   :  { %v1407_v6 = vadd.f32 %v1638_v60, %v1406_v3 }
0x1be1   :  { %v1411_v7 = vsel %vm1410_vm12, %v1638_v60, %v1407_v6 }
0x1be2   :  { %v1416_v62 = vsel %vm1413_vm3, %v1415_v61, %v1411_v7 }
0x1be3   :  { %v1430_v13 = vsub.f32 1.0, %v1416_v62  ;;  %v1436_v16 = vmul.f32 %v1416_v62, %v1368_v52 }
0x1c39   :  { %v1421_v10 = vpop.permute.xlu1 %1420 }
0x1c3a   :  { %v1423_v63 = vmul.f32 %v1421_v10, %v1416_v62 }
0x1c3c   :  { %1425 = vrot.lane.b32.xlu2 %v1423_v63, %s1829_s19 }
0x1c96   :  { %v1426_v11 = vpop.permute.xlu2 %1425 }
0x1c97   :  { %v1428_v0 = vadd.f32 %v1426_v11, %v1375_v57 }
0x1c99   :  { %1639 = vtanh.f32 %v1428_v0 }
0x1c9f   :  { %v1640_v12 = vpop.eup %1639 }
0x1ca0   :  { %1432 = vrot.lane.b32.xlu0 %v1640_v12, %s1830_s3 }
0x1d12   :  { %v1433_v15 = vpop.permute.xlu0 %1432 }
0x1d13   :  { %v1435_v18 = vmul.f32 %v1433_v15, %v1430_v13 }
0x1d15   :  { %v1437_v19 = vadd.f32 %v1436_v16, %v1435_v18 }
0x1d17   :  { %1439 = vrot.lane.b32.xlu1 %v1437_v19, %s1830_s3 }
0x1d89   :  { %v1440_v20 = vpop.permute.xlu1 %1439 }
0x1d8a   :  { %1443 = vst.msk [vmem:[#allocation14 + $0xe] sm:$0x3] %vm118_vm0, %v1440_v20 }
0x1d8b   :  { %1444 = vst.msk [vmem:[#allocation2 + $0x2] sm:$0x3] %vm118_vm0, %v1440_v20  ;;  %1464 = dma.vmem_to_hbm [thread:$0]  %s1457_s24, 256, %s1459_s26, [#allocation7], %s1824_s11, %s1824_s11, %s1825_s12  }
0x1d92   :  { %v1449_v21 = vld [vmem:[#allocation2 + $0x2] sm:$0x3] }
0x1d93   :  { %1451 = vst.msk [vmem:[#allocation15 + $0x2] sm:$0x3] %vm118_vm0, %v1449_v21 }
0x1d94   :  { %1477 = dma.vmem_to_hbm [thread:$0]  %s1470_s27, 64, %s1472_s30, [#allocation16], %s1824_s11, %s1824_s11, %s1825_s12  }
0x1d95   :  { %1815 = dma.done.wait [#allocation7], 256  }
0x1d96   :  { %1816 = vsyncadd [#allocation7], 4294967040 }
0x1d97   :  { %1817 = dma.done.wait [#allocation16], 64  }
0x1d98   :  { %1818 = vsyncadd [#allocation16], 4294967232 }
0x1d99   :  { %1486 = vsyncpa [#allocation6], 1 }
0x1d9a   :  { %1487 = vsyncpa [#allocation9], 1 }
0x1d9b   :  { %1488 = vsyncpa [#allocation12], 1 }
0x1d9c   :  { %1489 = vsyncpa [#allocation7], 1 }
0x1d9d   :  { %1490 = vsyncpa [#allocation16], 1 }

</bundles_post_ra>
